<compile_context>
chip_gen: v7x
topology: tpu7x:2x2x1
jax: 0.10.0
libtpu: 0.0.40
codegen_flags: <defaults>
</compile_context>

<pallas_src>
import functools

import numpy as np
import jax
import jax.numpy as jnp
from jax import lax
from jax.experimental import pallas as pl
from jax.experimental.pallas import tpu as pltpu


def _sigmoid(v):
    # exp rides the EUP slot; exact f32 divide on the VPU (keeps 1e-4 tolerance).
    return 1.0 / (1.0 + jnp.exp(-v))


def _silu(v):
    return v * _sigmoid(v)


def _ghostconv_kernel(x_ref, w1_ref, b1_ref, w2_ref, b2_ref, mask_ref,
                      out_ref, slab_ref, *, W, K, nb):
    """One block of `nb` images per grid step.

    x_ref   : (nb*c1, P)    input, image-major / channel-minor rows, P = H*W lanes
    w1_ref  : (c_, c1)      1x1 conv weight (BN1 scale folded)
    b1_ref  : (nb*c_, 1)    BN1 shift, replicated per image
    w2_ref  : (nb*c_, K*K)  depthwise taps (BN2 scale folded), replicated per image
    b2_ref  : (nb*c_, 1)    BN2 shift, replicated per image
    mask_ref: (K*K, P)      {0,1} per-lane boundary mask per tap (grid-invariant)
    out_ref : (nb*2*c_, P)  per-image channel-concat output [y_n ; z_n]
    slab_ref: (2, nb*c_, P) VMEM scratch: slab[0] = packed y, slab[1] = packed z
    """
    c_, c1 = w1_ref.shape
    P = x_ref.shape[-1]
    pad = K // 2
    ctr = (K * K) // 2

    xv = x_ref[...]            # (nb*c1, P) -- whole image block, one load
    w1 = w1_ref[...]           # (c_, c1)
    w2 = w2_ref[...]           # (nb*c_, K*K) hoisted out of the tap loop
    msk = mask_ref[...]        # (K*K, P)

    # ---- cv1: 1x1 conv (+folded BN) + SiLU, packed across images -----------
    # Tiny c1 contraction stays on the VPU (MXU only pays off at >=64-128 ch).
    for n in range(nb):
        acc = w1[:, 0:1] * xv[n * c1:n * c1 + 1, :]
        for c in range(1, c1):
            acc = acc + w1[:, c:c + 1] * xv[n * c1 + c:n * c1 + c + 1, :]
        slab_ref[0, n * c_:(n + 1) * c_, :] = acc        # pack -> 8 sublanes
    y = _silu(slab_ref[0] + b1_ref[...])                 # (nb*c_, P), full vregs
    slab_ref[0] = y                                      # keep for output copy

    # ---- cv2: KxK depthwise conv (+folded BN) + SiLU ------------------------
    # Each tap = lane-roll of y (XLU slot) * precomputed boundary mask * weight.
    acc2 = y * w2[:, ctr:ctr + 1]                        # center tap, mask == 1
    t = 0
    for dh in range(-pad, pad + 1):
        for dw in range(-pad, pad + 1):
            if not (dh == 0 and dw == 0):
                s = dh * W + dw                          # flat lane offset of tap
                shifted = pltpu.roll(y, shift=(-s) % P, axis=1)   # [:,p] = y[:,p+s]
                acc2 = acc2 + (shifted * msk[t:t + 1, :]) * w2[:, t:t + 1]
            t += 1
    z = _silu(acc2 + b2_ref[...])                        # (nb*c_, P)
    slab_ref[1] = z

    # ---- per-image channel concat: out[n] = [y_n ; z_n] ---------------------
    # TODO(synk): these are 4-sublane partial stores; a roll+select assembly of
    #             full (8, P) tiles would avoid the masked stores as c_ grows.
    for n in range(nb):
        o = n * 2 * c_
        out_ref[o:o + c_, :] = slab_ref[0, n * c_:(n + 1) * c_, :]
        out_ref[o + c_:o + 2 * c_, :] = slab_ref[1, n * c_:(n + 1) * c_, :]


def ghost_conv(x_nchw, w1f, b1, w2f, b2, *, images_per_block=None):
    """Fused GhostConv forward.

    x_nchw: (N, c1, H, W) f32.  w1f: (c_, c1), w2f: (c_, 5, 5) BN-folded
    weights; b1, b2: (c_,) BN shifts.  Returns (N, 2*c_, H, W).
    """
    N, c1, H, W = x_nchw.shape
    c_ = w1f.shape[0]
    K = w2f.shape[-1]
    P = H * W
    nb = N if images_per_block is None else images_per_block
    assert N % nb == 0, "batch must be divisible by images_per_block"
    assert P % 128 == 0, "flattened spatial dim must be a multiple of 128"
    R = nb * c_
    pad = K // 2

    # Free reshape only (no transpose / relayout copy on the HBM path).
    x2 = x_nchw.reshape(N * c1, P)

    # Replicate depthwise weights / BN shifts per image in the block so the
    # packed (nb*c_, P) slab is processed with plain row/column broadcasts.
    w2_rep = jnp.tile(w2f.reshape(c_, K * K), (nb, 1))        # (R, K*K)
    b1_rep = jnp.tile(b1.reshape(c_, 1), (nb, 1))             # (R, 1)
    b2_rep = jnp.tile(b2.reshape(c_, 1), (nb, 1))             # (R, 1)

    # Grid-invariant per-lane boundary masks for the K*K taps (dh-major order,
    # matching both the tap loop and the reshaped weight layout).
    hh = np.arange(H)[:, None]
    ww = np.arange(W)[None, :]
    rows = []
    for dh in range(-pad, pad + 1):
        for dw in range(-pad, pad + 1):
            ok = (hh + dh >= 0) & (hh + dh < H) & (ww + dw >= 0) & (ww + dw < W)
            rows.append(ok.reshape(P))
    mask = jnp.asarray(np.stack(rows), dtype=jnp.float32)     # (K*K, P)

    kernel = functools.partial(_ghostconv_kernel, W=W, K=K, nb=nb)
    out2 = pl.pallas_call(
        kernel,
        out_shape=jax.ShapeDtypeStruct((N * 2 * c_, P), jnp.float32),
        grid=(N // nb,),
        in_specs=[
            pl.BlockSpec((nb * c1, P), lambda i: (i, 0)),     # image block
            pl.BlockSpec((c_, c1), lambda i: (0, 0)),         # 1x1 weight (resident)
            pl.BlockSpec((R, 1), lambda i: (0, 0)),           # BN1 shift (replicated)
            pl.BlockSpec((R, K * K), lambda i: (0, 0)),       # depthwise taps (repl.)
            pl.BlockSpec((R, 1), lambda i: (0, 0)),           # BN2 shift (replicated)
            pl.BlockSpec((K * K, P), lambda i: (0, 0)),       # boundary masks
        ],
        out_specs=pl.BlockSpec((nb * 2 * c_, P), lambda i: (i, 0)),
        scratch_shapes=[pltpu.VMEM((2, R, P), jnp.float32)],
        compiler_params=pltpu.CompilerParams(
            dimension_semantics=("parallel",)),               # v7x: image blocks / 2 TCs
    )(x2, w1f, b1_rep, w2_rep, b2_rep, mask)

    return out2.reshape(N, 2 * c_, H, W)


def make_params(key, c1, c2, k_dw=5):
    """Random conv weights + BatchNorm (eval mode) folded into scale/shift."""
    c_ = c2 // 2
    ks = jax.random.split(key, 4)

    def bn_fold(k, c):
        k1, k2, k3, k4 = jax.random.split(k, 4)
        gamma = jax.random.uniform(k1, (c,), minval=0.5, maxval=1.5)
        beta = 0.1 * jax.random.normal(k2, (c,))
        mean = 0.1 * jax.random.normal(k3, (c,))
        var = jax.random.uniform(k4, (c,), minval=0.5, maxval=1.5)
        scale = gamma / jnp.sqrt(var + 1e-5)
        shift = beta - mean * scale
        return scale.astype(jnp.float32), shift.astype(jnp.float32)

    w1 = 0.4 * jax.random.normal(ks[0], (c_, c1), jnp.float32)          # (c_, c1, 1, 1) squeezed
    w2 = 0.1 * jax.random.normal(ks[1], (c_, k_dw, k_dw), jnp.float32)  # (c_, 1, k, k) squeezed
    s1, t1 = bn_fold(ks[2], c_)
    s2, t2 = bn_fold(ks[3], c_)
    w1f = w1 * s1[:, None]                    # fold BN1 scale into cv1
    w2f = w2 * s2[:, None, None]              # fold BN2 scale into depthwise cv2
    return w1f, t1, w2f, t2


def ref_ghostconv(x_nchw, w1f, b1, w2f, b2):
    """Pure-JAX reference of the eval-mode GhostConv forward."""
    c_ = w1f.shape[0]
    x = jnp.transpose(x_nchw, (0, 2, 3, 1))                             # NHWC
    y = jnp.einsum('nhwc,kc->nhwk', x, w1f) + b1
    y = y * _sigmoid(y)
    w_hwio = jnp.transpose(w2f, (1, 2, 0))[:, :, None, :]               # (k, k, 1, c_)
    z = lax.conv_general_dilated(y, w_hwio, (1, 1), 'SAME',
                                 dimension_numbers=('NHWC', 'HWIO', 'NHWC'),
                                 feature_group_count=c_)
    z = z + b2
    z = z * _sigmoid(z)
    out = jnp.concatenate([y, z], axis=-1)
    return jnp.transpose(out, (0, 3, 1, 2))                             # back to NCHW


if __name__ == "__main__":
    key = jax.random.PRNGKey(0)
    kx, kp = jax.random.split(key)

    # GhostConv(c1=4, c2=8, k=1, s=1, g=1, act=True): cv1 1x1 (c_=4), cv2 5x5 dw.
    N, c1, H, W = 2, 4, 16, 16
    c2 = 8

    x = jax.random.normal(kx, (N, c1, H, W), jnp.float32)               # PyTorch NCHW input
    w1f, b1, w2f, b2 = make_params(kp, c1, c2)

    out = jax.block_until_ready(ghost_conv(x, w1f, b1, w2f, b2))

    ref = ref_ghostconv(x, w1f, b1, w2f, b2)
    np.testing.assert_allclose(np.asarray(out), np.asarray(ref), rtol=1e-4, atol=1e-4)
    print("KERNEL_OK")
</pallas_src>

<mosaic_0001>
module attributes {stable_mosaic.version = 11 : i64} {
  func.func @_ghostconv_kernel(%arg0: i32, %arg1: memref<8x256xf32, #tpu.memory_space<vmem>>, %arg2: memref<4x4xf32, #tpu.memory_space<vmem>>, %arg3: memref<8x1xf32, #tpu.memory_space<vmem>>, %arg4: memref<8x25xf32, #tpu.memory_space<vmem>>, %arg5: memref<8x1xf32, #tpu.memory_space<vmem>>, %arg6: memref<25x256xf32, #tpu.memory_space<vmem>>, %arg7: memref<16x256xf32, #tpu.memory_space<vmem>>, %arg8: memref<2x8x256xf32, #tpu.memory_space<vmem>>) attributes {dimension_semantics = [#tpu.dimension_semantics<parallel>], iteration_bounds = array<i64: 1>, scalar_prefetch = 0 : i64, scratch_operands = 1 : i64, tpu.core_type = #tpu.core_type<tc>, window_params = [{transform_indices = @transform_0, window_bounds = array<i64: 8, 256>}, {pipeline_mode = #tpu.pipeline_mode<synchronous>, transform_indices = @transform_1, window_bounds = array<i64: 4, 4>}, {pipeline_mode = #tpu.pipeline_mode<synchronous>, transform_indices = @transform_2, window_bounds = array<i64: 8, 1>}, {pipeline_mode = #tpu.pipeline_mode<synchronous>, transform_indices = @transform_3, window_bounds = array<i64: 8, 25>}, {pipeline_mode = #tpu.pipeline_mode<synchronous>, transform_indices = @transform_4, window_bounds = array<i64: 8, 1>}, {pipeline_mode = #tpu.pipeline_mode<synchronous>, transform_indices = @transform_5, window_bounds = array<i64: 25, 256>}, {transform_indices = @transform_6, window_bounds = array<i64: 16, 256>}]} {
    %c0 = arith.constant 0 : index
    %c0_0 = arith.constant 0 : index
    %0 = vector.load %arg1[%c0, %c0_0] : memref<8x256xf32, #tpu.memory_space<vmem>>, vector<8x256xf32>
    %c0_1 = arith.constant 0 : index
    %c0_2 = arith.constant 0 : index
    %1 = vector.load %arg2[%c0_1, %c0_2] : memref<4x4xf32, #tpu.memory_space<vmem>>, vector<4x4xf32>
    %c0_3 = arith.constant 0 : index
    %c0_4 = arith.constant 0 : index
    %2 = vector.load %arg4[%c0_3, %c0_4] : memref<8x25xf32, #tpu.memory_space<vmem>>, vector<8x25xf32>
    %c0_5 = arith.constant 0 : index
    %c0_6 = arith.constant 0 : index
    %3 = vector.load %arg6[%c0_5, %c0_6] : memref<25x256xf32, #tpu.memory_space<vmem>>, vector<25x256xf32>
    %4 = vector.extract_strided_slice %1 {offsets = [0, 0], sizes = [4, 1], strides = [1, 1]} : vector<4x4xf32> to vector<4x1xf32>
    %5 = vector.extract_strided_slice %0 {offsets = [0, 0], sizes = [1, 256], strides = [1, 1]} : vector<8x256xf32> to vector<1x256xf32>
    %6 = vector.broadcast %4 : vector<4x1xf32> to vector<4x256xf32>
    %7 = vector.broadcast %5 : vector<1x256xf32> to vector<4x256xf32>
    %8 = arith.mulf %6, %7 : vector<4x256xf32>
    %9 = vector.extract_strided_slice %1 {offsets = [0, 1], sizes = [4, 1], strides = [1, 1]} : vector<4x4xf32> to vector<4x1xf32>
    %10 = vector.extract_strided_slice %0 {offsets = [1, 0], sizes = [1, 256], strides = [1, 1]} : vector<8x256xf32> to vector<1x256xf32>
    %11 = vector.broadcast %9 : vector<4x1xf32> to vector<4x256xf32>
    %12 = vector.broadcast %10 : vector<1x256xf32> to vector<4x256xf32>
    %13 = arith.mulf %11, %12 : vector<4x256xf32>
    %14 = arith.addf %8, %13 : vector<4x256xf32>
    %15 = vector.extract_strided_slice %1 {offsets = [0, 2], sizes = [4, 1], strides = [1, 1]} : vector<4x4xf32> to vector<4x1xf32>
    %16 = vector.extract_strided_slice %0 {offsets = [2, 0], sizes = [1, 256], strides = [1, 1]} : vector<8x256xf32> to vector<1x256xf32>
    %17 = vector.broadcast %15 : vector<4x1xf32> to vector<4x256xf32>
    %18 = vector.broadcast %16 : vector<1x256xf32> to vector<4x256xf32>
    %19 = arith.mulf %17, %18 : vector<4x256xf32>
    %20 = arith.addf %14, %19 : vector<4x256xf32>
    %21 = vector.extract_strided_slice %1 {offsets = [0, 3], sizes = [4, 1], strides = [1, 1]} : vector<4x4xf32> to vector<4x1xf32>
    %22 = vector.extract_strided_slice %0 {offsets = [3, 0], sizes = [1, 256], strides = [1, 1]} : vector<8x256xf32> to vector<1x256xf32>
    %23 = vector.broadcast %21 : vector<4x1xf32> to vector<4x256xf32>
    %24 = vector.broadcast %22 : vector<1x256xf32> to vector<4x256xf32>
    %25 = arith.mulf %23, %24 : vector<4x256xf32>
    %26 = arith.addf %20, %25 : vector<4x256xf32>
    %c0_7 = arith.constant 0 : index
    %c0_8 = arith.constant 0 : index
    %c0_9 = arith.constant 0 : index
    %27 = vector.load %arg8[%c0_7, %c0_8, %c0_9] : memref<2x8x256xf32, #tpu.memory_space<vmem>>, vector<1x4x256xf32>
    %28 = vector.shape_cast %27 : vector<1x4x256xf32> to vector<4x256xf32>
    %29 = vector.shape_cast %26 : vector<4x256xf32> to vector<1x4x256xf32>
    tpu.vector_store %arg8[%c0_7, %c0_8, %c0_9], %29 {strides = array<i32>} : memref<2x8x256xf32, #tpu.memory_space<vmem>>, vector<1x4x256xf32>,
    %30 = vector.extract_strided_slice %1 {offsets = [0, 0], sizes = [4, 1], strides = [1, 1]} : vector<4x4xf32> to vector<4x1xf32>
    %31 = vector.extract_strided_slice %0 {offsets = [4, 0], sizes = [1, 256], strides = [1, 1]} : vector<8x256xf32> to vector<1x256xf32>
    %32 = vector.broadcast %30 : vector<4x1xf32> to vector<4x256xf32>
    %33 = vector.broadcast %31 : vector<1x256xf32> to vector<4x256xf32>
    %34 = arith.mulf %32, %33 : vector<4x256xf32>
    %35 = vector.extract_strided_slice %1 {offsets = [0, 1], sizes = [4, 1], strides = [1, 1]} : vector<4x4xf32> to vector<4x1xf32>
    %36 = vector.extract_strided_slice %0 {offsets = [5, 0], sizes = [1, 256], strides = [1, 1]} : vector<8x256xf32> to vector<1x256xf32>
    %37 = vector.broadcast %35 : vector<4x1xf32> to vector<4x256xf32>
    %38 = vector.broadcast %36 : vector<1x256xf32> to vector<4x256xf32>
    %39 = arith.mulf %37, %38 : vector<4x256xf32>
    %40 = arith.addf %34, %39 : vector<4x256xf32>
    %41 = vector.extract_strided_slice %1 {offsets = [0, 2], sizes = [4, 1], strides = [1, 1]} : vector<4x4xf32> to vector<4x1xf32>
    %42 = vector.extract_strided_slice %0 {offsets = [6, 0], sizes = [1, 256], strides = [1, 1]} : vector<8x256xf32> to vector<1x256xf32>
    %43 = vector.broadcast %41 : vector<4x1xf32> to vector<4x256xf32>
    %44 = vector.broadcast %42 : vector<1x256xf32> to vector<4x256xf32>
    %45 = arith.mulf %43, %44 : vector<4x256xf32>
    %46 = arith.addf %40, %45 : vector<4x256xf32>
    %47 = vector.extract_strided_slice %1 {offsets = [0, 3], sizes = [4, 1], strides = [1, 1]} : vector<4x4xf32> to vector<4x1xf32>
    %48 = vector.extract_strided_slice %0 {offsets = [7, 0], sizes = [1, 256], strides = [1, 1]} : vector<8x256xf32> to vector<1x256xf32>
    %49 = vector.broadcast %47 : vector<4x1xf32> to vector<4x256xf32>
    %50 = vector.broadcast %48 : vector<1x256xf32> to vector<4x256xf32>
    %51 = arith.mulf %49, %50 : vector<4x256xf32>
    %52 = arith.addf %46, %51 : vector<4x256xf32>
    %c0_10 = arith.constant 0 : index
    %c4 = arith.constant 4 : index
    %c0_11 = arith.constant 0 : index
    %53 = vector.load %arg8[%c0_10, %c4, %c0_11] : memref<2x8x256xf32, #tpu.memory_space<vmem>>, vector<1x4x256xf32>
    %54 = vector.shape_cast %53 : vector<1x4x256xf32> to vector<4x256xf32>
    %55 = vector.shape_cast %52 : vector<4x256xf32> to vector<1x4x256xf32>
    tpu.vector_store %arg8[%c0_10, %c4, %c0_11], %55 {strides = array<i32>} : memref<2x8x256xf32, #tpu.memory_space<vmem>>, vector<1x4x256xf32>,
    %c0_12 = arith.constant 0 : index
    %c0_13 = arith.constant 0 : index
    %c0_14 = arith.constant 0 : index
    %56 = vector.load %arg8[%c0_12, %c0_13, %c0_14] : memref<2x8x256xf32, #tpu.memory_space<vmem>>, vector<1x8x256xf32>
    %57 = vector.shape_cast %56 : vector<1x8x256xf32> to vector<8x256xf32>
    %c0_15 = arith.constant 0 : index
    %c0_16 = arith.constant 0 : index
    %58 = vector.load %arg3[%c0_15, %c0_16] : memref<8x1xf32, #tpu.memory_space<vmem>>, vector<8x1xf32>
    %59 = vector.broadcast %58 : vector<8x1xf32> to vector<8x256xf32>
    %60 = arith.addf %57, %59 : vector<8x256xf32>
    %cst = arith.constant 0.000000e+00 : f32
    %61 = vector.broadcast %cst : f32 to vector<8x256xf32>
    %62 = arith.subf %61, %60 : vector<8x256xf32>
    %63 = math.exp %62 : vector<8x256xf32>
    %cst_17 = arith.constant 1.000000e+00 : f32
    %64 = vector.broadcast %cst_17 : f32 to vector<8x256xf32>
    %65 = arith.addf %64, %63 : vector<8x256xf32>
    %cst_18 = arith.constant 1.000000e+00 : f32
    %66 = vector.broadcast %cst_18 : f32 to vector<8x256xf32>
    %67 = arith.divf %66, %65 : vector<8x256xf32>
    %68 = arith.mulf %60, %67 : vector<8x256xf32>
    %c0_19 = arith.constant 0 : index
    %c0_20 = arith.constant 0 : index
    %c0_21 = arith.constant 0 : index
    %69 = vector.load %arg8[%c0_19, %c0_20, %c0_21] : memref<2x8x256xf32, #tpu.memory_space<vmem>>, vector<1x8x256xf32>
    %70 = vector.shape_cast %69 : vector<1x8x256xf32> to vector<8x256xf32>
    %71 = vector.shape_cast %68 : vector<8x256xf32> to vector<1x8x256xf32>
    tpu.vector_store %arg8[%c0_19, %c0_20, %c0_21], %71 {strides = array<i32>} : memref<2x8x256xf32, #tpu.memory_space<vmem>>, vector<1x8x256xf32>,
    %72 = vector.extract_strided_slice %2 {offsets = [0, 12], sizes = [8, 1], strides = [1, 1]} : vector<8x25xf32> to vector<8x1xf32>
    %73 = vector.broadcast %72 : vector<8x1xf32> to vector<8x256xf32>
    %74 = arith.mulf %68, %73 : vector<8x256xf32>
    %c34_i32 = arith.constant 34 : i32
    %75 = tpu.dynamic_rotate %68 by %c34_i32 dim 1 : vector<8x256xf32>, i32 -> vector<8x256xf32>
    %76 = vector.extract_strided_slice %3 {offsets = [0, 0], sizes = [1, 256], strides = [1, 1]} : vector<25x256xf32> to vector<1x256xf32>
    %77 = vector.broadcast %76 : vector<1x256xf32> to vector<8x256xf32>
    %78 = arith.mulf %75, %77 : vector<8x256xf32>
    %79 = vector.extract_strided_slice %2 {offsets = [0, 0], sizes = [8, 1], strides = [1, 1]} : vector<8x25xf32> to vector<8x1xf32>
    %80 = vector.broadcast %79 : vector<8x1xf32> to vector<8x256xf32>
    %81 = arith.mulf %78, %80 : vector<8x256xf32>
    %82 = arith.addf %74, %81 : vector<8x256xf32>
    %c33_i32 = arith.constant 33 : i32
    %83 = tpu.dynamic_rotate %68 by %c33_i32 dim 1 : vector<8x256xf32>, i32 -> vector<8x256xf32>
    %84 = vector.extract_strided_slice %3 {offsets = [1, 0], sizes = [1, 256], strides = [1, 1]} : vector<25x256xf32> to vector<1x256xf32>
    %85 = vector.broadcast %84 : vector<1x256xf32> to vector<8x256xf32>
    %86 = arith.mulf %83, %85 : vector<8x256xf32>
    %87 = vector.extract_strided_slice %2 {offsets = [0, 1], sizes = [8, 1], strides = [1, 1]} : vector<8x25xf32> to vector<8x1xf32>
    %88 = vector.broadcast %87 : vector<8x1xf32> to vector<8x256xf32>
    %89 = arith.mulf %86, %88 : vector<8x256xf32>
    %90 = arith.addf %82, %89 : vector<8x256xf32>
    %c32_i32 = arith.constant 32 : i32
    %91 = tpu.dynamic_rotate %68 by %c32_i32 dim 1 : vector<8x256xf32>, i32 -> vector<8x256xf32>
    %92 = vector.extract_strided_slice %3 {offsets = [2, 0], sizes = [1, 256], strides = [1, 1]} : vector<25x256xf32> to vector<1x256xf32>
    %93 = vector.broadcast %92 : vector<1x256xf32> to vector<8x256xf32>
    %94 = arith.mulf %91, %93 : vector<8x256xf32>
    %95 = vector.extract_strided_slice %2 {offsets = [0, 2], sizes = [8, 1], strides = [1, 1]} : vector<8x25xf32> to vector<8x1xf32>
    %96 = vector.broadcast %95 : vector<8x1xf32> to vector<8x256xf32>
    %97 = arith.mulf %94, %96 : vector<8x256xf32>
    %98 = arith.addf %90, %97 : vector<8x256xf32>
    %c31_i32 = arith.constant 31 : i32
    %99 = tpu.dynamic_rotate %68 by %c31_i32 dim 1 : vector<8x256xf32>, i32 -> vector<8x256xf32>
    %100 = vector.extract_strided_slice %3 {offsets = [3, 0], sizes = [1, 256], strides = [1, 1]} : vector<25x256xf32> to vector<1x256xf32>
    %101 = vector.broadcast %100 : vector<1x256xf32> to vector<8x256xf32>
    %102 = arith.mulf %99, %101 : vector<8x256xf32>
    %103 = vector.extract_strided_slice %2 {offsets = [0, 3], sizes = [8, 1], strides = [1, 1]} : vector<8x25xf32> to vector<8x1xf32>
    %104 = vector.broadcast %103 : vector<8x1xf32> to vector<8x256xf32>
    %105 = arith.mulf %102, %104 : vector<8x256xf32>
    %106 = arith.addf %98, %105 : vector<8x256xf32>
    %c30_i32 = arith.constant 30 : i32
    %107 = tpu.dynamic_rotate %68 by %c30_i32 dim 1 : vector<8x256xf32>, i32 -> vector<8x256xf32>
    %108 = vector.extract_strided_slice %3 {offsets = [4, 0], sizes = [1, 256], strides = [1, 1]} : vector<25x256xf32> to vector<1x256xf32>
    %109 = vector.broadcast %108 : vector<1x256xf32> to vector<8x256xf32>
    %110 = arith.mulf %107, %109 : vector<8x256xf32>
    %111 = vector.extract_strided_slice %2 {offsets = [0, 4], sizes = [8, 1], strides = [1, 1]} : vector<8x25xf32> to vector<8x1xf32>
    %112 = vector.broadcast %111 : vector<8x1xf32> to vector<8x256xf32>
    %113 = arith.mulf %110, %112 : vector<8x256xf32>
    %114 = arith.addf %106, %113 : vector<8x256xf32>
    %c18_i32 = arith.constant 18 : i32
    %115 = tpu.dynamic_rotate %68 by %c18_i32 dim 1 : vector<8x256xf32>, i32 -> vector<8x256xf32>
    %116 = vector.extract_strided_slice %3 {offsets = [5, 0], sizes = [1, 256], strides = [1, 1]} : vector<25x256xf32> to vector<1x256xf32>
    %117 = vector.broadcast %116 : vector<1x256xf32> to vector<8x256xf32>
    %118 = arith.mulf %115, %117 : vector<8x256xf32>
    %119 = vector.extract_strided_slice %2 {offsets = [0, 5], sizes = [8, 1], strides = [1, 1]} : vector<8x25xf32> to vector<8x1xf32>
    %120 = vector.broadcast %119 : vector<8x1xf32> to vector<8x256xf32>
    %121 = arith.mulf %118, %120 : vector<8x256xf32>
    %122 = arith.addf %114, %121 : vector<8x256xf32>
    %c17_i32 = arith.constant 17 : i32
    %123 = tpu.dynamic_rotate %68 by %c17_i32 dim 1 : vector<8x256xf32>, i32 -> vector<8x256xf32>
    %124 = vector.extract_strided_slice %3 {offsets = [6, 0], sizes = [1, 256], strides = [1, 1]} : vector<25x256xf32> to vector<1x256xf32>
    %125 = vector.broadcast %124 : vector<1x256xf32> to vector<8x256xf32>
    %126 = arith.mulf %123, %125 : vector<8x256xf32>
    %127 = vector.extract_strided_slice %2 {offsets = [0, 6], sizes = [8, 1], strides = [1, 1]} : vector<8x25xf32> to vector<8x1xf32>
    %128 = vector.broadcast %127 : vector<8x1xf32> to vector<8x256xf32>
    %129 = arith.mulf %126, %128 : vector<8x256xf32>
    %130 = arith.addf %122, %129 : vector<8x256xf32>
    %c16_i32 = arith.constant 16 : i32
    %131 = tpu.dynamic_rotate %68 by %c16_i32 dim 1 : vector<8x256xf32>, i32 -> vector<8x256xf32>
    %132 = vector.extract_strided_slice %3 {offsets = [7, 0], sizes = [1, 256], strides = [1, 1]} : vector<25x256xf32> to vector<1x256xf32>
    %133 = vector.broadcast %132 : vector<1x256xf32> to vector<8x256xf32>
    %134 = arith.mulf %131, %133 : vector<8x256xf32>
    %135 = vector.extract_strided_slice %2 {offsets = [0, 7], sizes = [8, 1], strides = [1, 1]} : vector<8x25xf32> to vector<8x1xf32>
    %136 = vector.broadcast %135 : vector<8x1xf32> to vector<8x256xf32>
    %137 = arith.mulf %134, %136 : vector<8x256xf32>
    %138 = arith.addf %130, %137 : vector<8x256xf32>
    %c15_i32 = arith.constant 15 : i32
    %139 = tpu.dynamic_rotate %68 by %c15_i32 dim 1 : vector<8x256xf32>, i32 -> vector<8x256xf32>
    %140 = vector.extract_strided_slice %3 {offsets = [8, 0], sizes = [1, 256], strides = [1, 1]} : vector<25x256xf32> to vector<1x256xf32>
    %141 = vector.broadcast %140 : vector<1x256xf32> to vector<8x256xf32>
    %142 = arith.mulf %139, %141 : vector<8x256xf32>
    %143 = vector.extract_strided_slice %2 {offsets = [0, 8], sizes = [8, 1], strides = [1, 1]} : vector<8x25xf32> to vector<8x1xf32>
    %144 = vector.broadcast %143 : vector<8x1xf32> to vector<8x256xf32>
    %145 = arith.mulf %142, %144 : vector<8x256xf32>
    %146 = arith.addf %138, %145 : vector<8x256xf32>
    %c14_i32 = arith.constant 14 : i32
    %147 = tpu.dynamic_rotate %68 by %c14_i32 dim 1 : vector<8x256xf32>, i32 -> vector<8x256xf32>
    %148 = vector.extract_strided_slice %3 {offsets = [9, 0], sizes = [1, 256], strides = [1, 1]} : vector<25x256xf32> to vector<1x256xf32>
    %149 = vector.broadcast %148 : vector<1x256xf32> to vector<8x256xf32>
    %150 = arith.mulf %147, %149 : vector<8x256xf32>
    %151 = vector.extract_strided_slice %2 {offsets = [0, 9], sizes = [8, 1], strides = [1, 1]} : vector<8x25xf32> to vector<8x1xf32>
    %152 = vector.broadcast %151 : vector<8x1xf32> to vector<8x256xf32>
    %153 = arith.mulf %150, %152 : vector<8x256xf32>
    %154 = arith.addf %146, %153 : vector<8x256xf32>
    %c2_i32 = arith.constant 2 : i32
    %155 = tpu.dynamic_rotate %68 by %c2_i32 dim 1 : vector<8x256xf32>, i32 -> vector<8x256xf32>
    %156 = vector.extract_strided_slice %3 {offsets = [10, 0], sizes = [1, 256], strides = [1, 1]} : vector<25x256xf32> to vector<1x256xf32>
    %157 = vector.broadcast %156 : vector<1x256xf32> to vector<8x256xf32>
    %158 = arith.mulf %155, %157 : vector<8x256xf32>
    %159 = vector.extract_strided_slice %2 {offsets = [0, 10], sizes = [8, 1], strides = [1, 1]} : vector<8x25xf32> to vector<8x1xf32>
    %160 = vector.broadcast %159 : vector<8x1xf32> to vector<8x256xf32>
    %161 = arith.mulf %158, %160 : vector<8x256xf32>
    %162 = arith.addf %154, %161 : vector<8x256xf32>
    %c1_i32 = arith.constant 1 : i32
    %163 = tpu.dynamic_rotate %68 by %c1_i32 dim 1 : vector<8x256xf32>, i32 -> vector<8x256xf32>
    %164 = vector.extract_strided_slice %3 {offsets = [11, 0], sizes = [1, 256], strides = [1, 1]} : vector<25x256xf32> to vector<1x256xf32>
    %165 = vector.broadcast %164 : vector<1x256xf32> to vector<8x256xf32>
    %166 = arith.mulf %163, %165 : vector<8x256xf32>
    %167 = vector.extract_strided_slice %2 {offsets = [0, 11], sizes = [8, 1], strides = [1, 1]} : vector<8x25xf32> to vector<8x1xf32>
    %168 = vector.broadcast %167 : vector<8x1xf32> to vector<8x256xf32>
    %169 = arith.mulf %166, %168 : vector<8x256xf32>
    %170 = arith.addf %162, %169 : vector<8x256xf32>
    %c255_i32 = arith.constant 255 : i32
    %171 = tpu.dynamic_rotate %68 by %c255_i32 dim 1 : vector<8x256xf32>, i32 -> vector<8x256xf32>
    %172 = vector.extract_strided_slice %3 {offsets = [13, 0], sizes = [1, 256], strides = [1, 1]} : vector<25x256xf32> to vector<1x256xf32>
    %173 = vector.broadcast %172 : vector<1x256xf32> to vector<8x256xf32>
    %174 = arith.mulf %171, %173 : vector<8x256xf32>
    %175 = vector.extract_strided_slice %2 {offsets = [0, 13], sizes = [8, 1], strides = [1, 1]} : vector<8x25xf32> to vector<8x1xf32>
    %176 = vector.broadcast %175 : vector<8x1xf32> to vector<8x256xf32>
    %177 = arith.mulf %174, %176 : vector<8x256xf32>
    %178 = arith.addf %170, %177 : vector<8x256xf32>
    %c254_i32 = arith.constant 254 : i32
    %179 = tpu.dynamic_rotate %68 by %c254_i32 dim 1 : vector<8x256xf32>, i32 -> vector<8x256xf32>
    %180 = vector.extract_strided_slice %3 {offsets = [14, 0], sizes = [1, 256], strides = [1, 1]} : vector<25x256xf32> to vector<1x256xf32>
    %181 = vector.broadcast %180 : vector<1x256xf32> to vector<8x256xf32>
    %182 = arith.mulf %179, %181 : vector<8x256xf32>
    %183 = vector.extract_strided_slice %2 {offsets = [0, 14], sizes = [8, 1], strides = [1, 1]} : vector<8x25xf32> to vector<8x1xf32>
    %184 = vector.broadcast %183 : vector<8x1xf32> to vector<8x256xf32>
    %185 = arith.mulf %182, %184 : vector<8x256xf32>
    %186 = arith.addf %178, %185 : vector<8x256xf32>
    %c242_i32 = arith.constant 242 : i32
    %187 = tpu.dynamic_rotate %68 by %c242_i32 dim 1 : vector<8x256xf32>, i32 -> vector<8x256xf32>
    %188 = vector.extract_strided_slice %3 {offsets = [15, 0], sizes = [1, 256], strides = [1, 1]} : vector<25x256xf32> to vector<1x256xf32>
    %189 = vector.broadcast %188 : vector<1x256xf32> to vector<8x256xf32>
    %190 = arith.mulf %187, %189 : vector<8x256xf32>
    %191 = vector.extract_strided_slice %2 {offsets = [0, 15], sizes = [8, 1], strides = [1, 1]} : vector<8x25xf32> to vector<8x1xf32>
    %192 = vector.broadcast %191 : vector<8x1xf32> to vector<8x256xf32>
    %193 = arith.mulf %190, %192 : vector<8x256xf32>
    %194 = arith.addf %186, %193 : vector<8x256xf32>
    %c241_i32 = arith.constant 241 : i32
    %195 = tpu.dynamic_rotate %68 by %c241_i32 dim 1 : vector<8x256xf32>, i32 -> vector<8x256xf32>
    %196 = vector.extract_strided_slice %3 {offsets = [16, 0], sizes = [1, 256], strides = [1, 1]} : vector<25x256xf32> to vector<1x256xf32>
    %197 = vector.broadcast %196 : vector<1x256xf32> to vector<8x256xf32>
    %198 = arith.mulf %195, %197 : vector<8x256xf32>
    %199 = vector.extract_strided_slice %2 {offsets = [0, 16], sizes = [8, 1], strides = [1, 1]} : vector<8x25xf32> to vector<8x1xf32>
    %200 = vector.broadcast %199 : vector<8x1xf32> to vector<8x256xf32>
    %201 = arith.mulf %198, %200 : vector<8x256xf32>
    %202 = arith.addf %194, %201 : vector<8x256xf32>
    %c240_i32 = arith.constant 240 : i32
    %203 = tpu.dynamic_rotate %68 by %c240_i32 dim 1 : vector<8x256xf32>, i32 -> vector<8x256xf32>
    %204 = vector.extract_strided_slice %3 {offsets = [17, 0], sizes = [1, 256], strides = [1, 1]} : vector<25x256xf32> to vector<1x256xf32>
    %205 = vector.broadcast %204 : vector<1x256xf32> to vector<8x256xf32>
    %206 = arith.mulf %203, %205 : vector<8x256xf32>
    %207 = vector.extract_strided_slice %2 {offsets = [0, 17], sizes = [8, 1], strides = [1, 1]} : vector<8x25xf32> to vector<8x1xf32>
    %208 = vector.broadcast %207 : vector<8x1xf32> to vector<8x256xf32>
    %209 = arith.mulf %206, %208 : vector<8x256xf32>
    %210 = arith.addf %202, %209 : vector<8x256xf32>
    %c239_i32 = arith.constant 239 : i32
    %211 = tpu.dynamic_rotate %68 by %c239_i32 dim 1 : vector<8x256xf32>, i32 -> vector<8x256xf32>
    %212 = vector.extract_strided_slice %3 {offsets = [18, 0], sizes = [1, 256], strides = [1, 1]} : vector<25x256xf32> to vector<1x256xf32>
    %213 = vector.broadcast %212 : vector<1x256xf32> to vector<8x256xf32>
    %214 = arith.mulf %211, %213 : vector<8x256xf32>
    %215 = vector.extract_strided_slice %2 {offsets = [0, 18], sizes = [8, 1], strides = [1, 1]} : vector<8x25xf32> to vector<8x1xf32>
    %216 = vector.broadcast %215 : vector<8x1xf32> to vector<8x256xf32>
    %217 = arith.mulf %214, %216 : vector<8x256xf32>
    %218 = arith.addf %210, %217 : vector<8x256xf32>
    %c238_i32 = arith.constant 238 : i32
    %219 = tpu.dynamic_rotate %68 by %c238_i32 dim 1 : vector<8x256xf32>, i32 -> vector<8x256xf32>
    %220 = vector.extract_strided_slice %3 {offsets = [19, 0], sizes = [1, 256], strides = [1, 1]} : vector<25x256xf32> to vector<1x256xf32>
    %221 = vector.broadcast %220 : vector<1x256xf32> to vector<8x256xf32>
    %222 = arith.mulf %219, %221 : vector<8x256xf32>
    %223 = vector.extract_strided_slice %2 {offsets = [0, 19], sizes = [8, 1], strides = [1, 1]} : vector<8x25xf32> to vector<8x1xf32>
    %224 = vector.broadcast %223 : vector<8x1xf32> to vector<8x256xf32>
    %225 = arith.mulf %222, %224 : vector<8x256xf32>
    %226 = arith.addf %218, %225 : vector<8x256xf32>
    %c226_i32 = arith.constant 226 : i32
    %227 = tpu.dynamic_rotate %68 by %c226_i32 dim 1 : vector<8x256xf32>, i32 -> vector<8x256xf32>
    %228 = vector.extract_strided_slice %3 {offsets = [20, 0], sizes = [1, 256], strides = [1, 1]} : vector<25x256xf32> to vector<1x256xf32>
    %229 = vector.broadcast %228 : vector<1x256xf32> to vector<8x256xf32>
    %230 = arith.mulf %227, %229 : vector<8x256xf32>
    %231 = vector.extract_strided_slice %2 {offsets = [0, 20], sizes = [8, 1], strides = [1, 1]} : vector<8x25xf32> to vector<8x1xf32>
    %232 = vector.broadcast %231 : vector<8x1xf32> to vector<8x256xf32>
    %233 = arith.mulf %230, %232 : vector<8x256xf32>
    %234 = arith.addf %226, %233 : vector<8x256xf32>
    %c225_i32 = arith.constant 225 : i32
    %235 = tpu.dynamic_rotate %68 by %c225_i32 dim 1 : vector<8x256xf32>, i32 -> vector<8x256xf32>
    %236 = vector.extract_strided_slice %3 {offsets = [21, 0], sizes = [1, 256], strides = [1, 1]} : vector<25x256xf32> to vector<1x256xf32>
    %237 = vector.broadcast %236 : vector<1x256xf32> to vector<8x256xf32>
    %238 = arith.mulf %235, %237 : vector<8x256xf32>
    %239 = vector.extract_strided_slice %2 {offsets = [0, 21], sizes = [8, 1], strides = [1, 1]} : vector<8x25xf32> to vector<8x1xf32>
    %240 = vector.broadcast %239 : vector<8x1xf32> to vector<8x256xf32>
    %241 = arith.mulf %238, %240 : vector<8x256xf32>
    %242 = arith.addf %234, %241 : vector<8x256xf32>
    %c224_i32 = arith.constant 224 : i32
    %243 = tpu.dynamic_rotate %68 by %c224_i32 dim 1 : vector<8x256xf32>, i32 -> vector<8x256xf32>
    %244 = vector.extract_strided_slice %3 {offsets = [22, 0], sizes = [1, 256], strides = [1, 1]} : vector<25x256xf32> to vector<1x256xf32>
    %245 = vector.broadcast %244 : vector<1x256xf32> to vector<8x256xf32>
    %246 = arith.mulf %243, %245 : vector<8x256xf32>
    %247 = vector.extract_strided_slice %2 {offsets = [0, 22], sizes = [8, 1], strides = [1, 1]} : vector<8x25xf32> to vector<8x1xf32>
    %248 = vector.broadcast %247 : vector<8x1xf32> to vector<8x256xf32>
    %249 = arith.mulf %246, %248 : vector<8x256xf32>
    %250 = arith.addf %242, %249 : vector<8x256xf32>
    %c223_i32 = arith.constant 223 : i32
    %251 = tpu.dynamic_rotate %68 by %c223_i32 dim 1 : vector<8x256xf32>, i32 -> vector<8x256xf32>
    %252 = vector.extract_strided_slice %3 {offsets = [23, 0], sizes = [1, 256], strides = [1, 1]} : vector<25x256xf32> to vector<1x256xf32>
    %253 = vector.broadcast %252 : vector<1x256xf32> to vector<8x256xf32>
    %254 = arith.mulf %251, %253 : vector<8x256xf32>
    %255 = vector.extract_strided_slice %2 {offsets = [0, 23], sizes = [8, 1], strides = [1, 1]} : vector<8x25xf32> to vector<8x1xf32>
    %256 = vector.broadcast %255 : vector<8x1xf32> to vector<8x256xf32>
    %257 = arith.mulf %254, %256 : vector<8x256xf32>
    %258 = arith.addf %250, %257 : vector<8x256xf32>
    %c222_i32 = arith.constant 222 : i32
    %259 = tpu.dynamic_rotate %68 by %c222_i32 dim 1 : vector<8x256xf32>, i32 -> vector<8x256xf32>
    %260 = vector.extract_strided_slice %3 {offsets = [24, 0], sizes = [1, 256], strides = [1, 1]} : vector<25x256xf32> to vector<1x256xf32>
    %261 = vector.broadcast %260 : vector<1x256xf32> to vector<8x256xf32>
    %262 = arith.mulf %259, %261 : vector<8x256xf32>
    %263 = vector.extract_strided_slice %2 {offsets = [0, 24], sizes = [8, 1], strides = [1, 1]} : vector<8x25xf32> to vector<8x1xf32>
    %264 = vector.broadcast %263 : vector<8x1xf32> to vector<8x256xf32>
    %265 = arith.mulf %262, %264 : vector<8x256xf32>
    %266 = arith.addf %258, %265 : vector<8x256xf32>
    %c0_22 = arith.constant 0 : index
    %c0_23 = arith.constant 0 : index
    %267 = vector.load %arg5[%c0_22, %c0_23] : memref<8x1xf32, #tpu.memory_space<vmem>>, vector<8x1xf32>
    %268 = vector.broadcast %267 : vector<8x1xf32> to vector<8x256xf32>
    %269 = arith.addf %266, %268 : vector<8x256xf32>
    %cst_24 = arith.constant 0.000000e+00 : f32
    %270 = vector.broadcast %cst_24 : f32 to vector<8x256xf32>
    %271 = arith.subf %270, %269 : vector<8x256xf32>
    %272 = math.exp %271 : vector<8x256xf32>
    %cst_25 = arith.constant 1.000000e+00 : f32
    %273 = vector.broadcast %cst_25 : f32 to vector<8x256xf32>
    %274 = arith.addf %273, %272 : vector<8x256xf32>
    %cst_26 = arith.constant 1.000000e+00 : f32
    %275 = vector.broadcast %cst_26 : f32 to vector<8x256xf32>
    %276 = arith.divf %275, %274 : vector<8x256xf32>
    %277 = arith.mulf %269, %276 : vector<8x256xf32>
    %c1 = arith.constant 1 : index
    %c0_27 = arith.constant 0 : index
    %c0_28 = arith.constant 0 : index
    %278 = vector.load %arg8[%c1, %c0_27, %c0_28] : memref<2x8x256xf32, #tpu.memory_space<vmem>>, vector<1x8x256xf32>
    %279 = vector.shape_cast %278 : vector<1x8x256xf32> to vector<8x256xf32>
    %280 = vector.shape_cast %277 : vector<8x256xf32> to vector<1x8x256xf32>
    tpu.vector_store %arg8[%c1, %c0_27, %c0_28], %280 {strides = array<i32>} : memref<2x8x256xf32, #tpu.memory_space<vmem>>, vector<1x8x256xf32>,
    %c0_29 = arith.constant 0 : index
    %c0_30 = arith.constant 0 : index
    %c0_31 = arith.constant 0 : index
    %281 = vector.load %arg8[%c0_29, %c0_30, %c0_31] : memref<2x8x256xf32, #tpu.memory_space<vmem>>, vector<1x4x256xf32>
    %282 = vector.shape_cast %281 : vector<1x4x256xf32> to vector<4x256xf32>
    %c0_32 = arith.constant 0 : index
    %c0_33 = arith.constant 0 : index
    %283 = vector.load %arg7[%c0_32, %c0_33] : memref<16x256xf32, #tpu.memory_space<vmem>>, vector<4x256xf32>
    tpu.vector_store %arg7[%c0_32, %c0_33], %282 {strides = array<i32>} : memref<16x256xf32, #tpu.memory_space<vmem>>, vector<4x256xf32>,
    %c1_34 = arith.constant 1 : index
    %c0_35 = arith.constant 0 : index
    %c0_36 = arith.constant 0 : index
    %284 = vector.load %arg8[%c1_34, %c0_35, %c0_36] : memref<2x8x256xf32, #tpu.memory_space<vmem>>, vector<1x4x256xf32>
    %285 = vector.shape_cast %284 : vector<1x4x256xf32> to vector<4x256xf32>
    %c4_37 = arith.constant 4 : index
    %c0_38 = arith.constant 0 : index
    %286 = vector.load %arg7[%c4_37, %c0_38] : memref<16x256xf32, #tpu.memory_space<vmem>>, vector<4x256xf32>
    tpu.vector_store %arg7[%c4_37, %c0_38], %285 {strides = array<i32>} : memref<16x256xf32, #tpu.memory_space<vmem>>, vector<4x256xf32>,
    %c0_39 = arith.constant 0 : index
    %c4_40 = arith.constant 4 : index
    %c0_41 = arith.constant 0 : index
    %287 = vector.load %arg8[%c0_39, %c4_40, %c0_41] : memref<2x8x256xf32, #tpu.memory_space<vmem>>, vector<1x4x256xf32>
    %288 = vector.shape_cast %287 : vector<1x4x256xf32> to vector<4x256xf32>
    %c8 = arith.constant 8 : index
    %c0_42 = arith.constant 0 : index
    %289 = vector.load %arg7[%c8, %c0_42] : memref<16x256xf32, #tpu.memory_space<vmem>>, vector<4x256xf32>
    tpu.vector_store %arg7[%c8, %c0_42], %288 {strides = array<i32>} : memref<16x256xf32, #tpu.memory_space<vmem>>, vector<4x256xf32>,
    %c1_43 = arith.constant 1 : index
    %c4_44 = arith.constant 4 : index
    %c0_45 = arith.constant 0 : index
    %290 = vector.load %arg8[%c1_43, %c4_44, %c0_45] : memref<2x8x256xf32, #tpu.memory_space<vmem>>, vector<1x4x256xf32>
    %291 = vector.shape_cast %290 : vector<1x4x256xf32> to vector<4x256xf32>
    %c12 = arith.constant 12 : index
    %c0_46 = arith.constant 0 : index
    %292 = vector.load %arg7[%c12, %c0_46] : memref<16x256xf32, #tpu.memory_space<vmem>>, vector<4x256xf32>
    tpu.vector_store %arg7[%c12, %c0_46], %291 {strides = array<i32>} : memref<16x256xf32, #tpu.memory_space<vmem>>, vector<4x256xf32>,
    return
  }
  func.func @transform_0(%arg0: i32) -> (i32, i32) {
    %c0_i32 = arith.constant 0 : i32
    %c0_i32_0 = arith.constant 0 : i32
    return %arg0, %c0_i32 : i32, i32
  }
  func.func @transform_1(%arg0: i32) -> (i32, i32) {
    %c0_i32 = arith.constant 0 : i32
    %c0_i32_0 = arith.constant 0 : i32
    %c0_i32_1 = arith.constant 0 : i32
    return %c0_i32, %c0_i32_0 : i32, i32
  }
  func.func @transform_2(%arg0: i32) -> (i32, i32) {
    %c0_i32 = arith.constant 0 : i32
    %c0_i32_0 = arith.constant 0 : i32
    %c0_i32_1 = arith.constant 0 : i32
    return %c0_i32, %c0_i32_0 : i32, i32
  }
  func.func @transform_3(%arg0: i32) -> (i32, i32) {
    %c0_i32 = arith.constant 0 : i32
    %c0_i32_0 = arith.constant 0 : i32
    %c0_i32_1 = arith.constant 0 : i32
    return %c0_i32, %c0_i32_0 : i32, i32
  }
  func.func @transform_4(%arg0: i32) -> (i32, i32) {
    %c0_i32 = arith.constant 0 : i32
    %c0_i32_0 = arith.constant 0 : i32
    %c0_i32_1 = arith.constant 0 : i32
    return %c0_i32, %c0_i32_0 : i32, i32
  }
  func.func @transform_5(%arg0: i32) -> (i32, i32) {
    %c0_i32 = arith.constant 0 : i32
    %c0_i32_0 = arith.constant 0 : i32
    %c0_i32_1 = arith.constant 0 : i32
    return %c0_i32, %c0_i32_0 : i32, i32
  }
  func.func @transform_6(%arg0: i32) -> (i32, i32) {
    %c0_i32 = arith.constant 0 : i32
    %c0_i32_0 = arith.constant 0 : i32
    return %arg0, %c0_i32 : i32, i32
  }
}

</mosaic_0001>

<bundles_post_ra>
// kernel: tpu_custom_call.1
= control target key start
LH: loop header
LB: loop body
LE: loop exit
PB: predicated region body
PF: predicated region fallthrough
CT: control target
= control target key end

     0   :  { %11 = vsyncpa [#allocation4], 0  ;;  %s1555_s0 = inlined_call_operand.vmem [shape: f32[8,256], index: 0, kind: input, shape index: {}]   ;;  %s1556_s1 = inlined_call_operand.hbm [shape: f32[4,4], index: 1, kind: input, shape index: {}]   ;;  %s1557_s2 = inlined_call_operand.vmem [shape: f32[8,1], index: 2, kind: input, shape index: {}]   ;;  %s1558_s3 = inlined_call_operand.vmem [shape: f32[8,25], index: 3, kind: input, shape index: {}]   ;;  %s1559_s4 = inlined_call_operand.vmem [shape: f32[8,1], index: 4, kind: input, shape index: {}]   ;;  %s1560_s5 = inlined_call_operand.hbm [shape: f32[25,256], index: 5, kind: input, shape index: {}]   ;;  %s1561_s6 = inlined_call_operand.hbm [shape: f32[16,256], index: 6, kind: output, shape index: {}]  }
   0x1   :  { %12 = vsyncpa [#allocation7], 0 }
   0x2   :  { %13 = vsyncpa [#allocation5], 0  ;;  %s1060_s21 = smov [#allocation3]   ;;  %s1061_s23 = smov [#allocation6]  }
   0x3   :  { %s22_s22 = sshll.u32 %s1060_s21, 4  ;;  %s37_s24 = sshll.u32 %s1061_s23, 4  ;;  %s23_s22 = int_to_ptr.vmem [resolvable:$true] %s22_s22  ;;  %s1148_s24 = int_to_ptr.vmem [resolvable:$true] %s37_s24 }
   0x4   :  { %s988_s27 = scalar_lea.hbm %s1556_s1, 64 }
   0x5   :  { %p989_p0 = scmp.ne.s32.totalorder %s1556_s1, %s988_s27  ;;  %p992_p1 = scmp.lt.u32.totalorder %s988_s27, %s1556_s1 }
   0x7   :  { %p994_p2 = pnand %p992_p1, %p989_p0 }
   0x9   :  { %997 = shalt.err (!%p994_p2)
}
   0xa   :  { %s998_s8 = scalar_lea.vmem %s23_s22, 64  ;;  %p1003_p4 = scmp.lt.s32.totalorder %s23_s22, %s23_s22 }
   0xb   :  { %p999_p3 = scmp.ne.s32.totalorder %s23_s22, %s998_s8  ;;  %p1004_p5 = scmp.lt.s32.totalorder %s998_s8, %s998_s8 }
   0xd   :  { %p1005_p6 = por %p1004_p5, %p1003_p4 }
   0xf   :  { %p1006_p7 = pnand %p1005_p6, %p999_p3 }
  0x11   :  { %1009 = shalt.err (!%p1006_p7)
}
  0x12   :  { %25 = dma.hbm_to_vmem [thread:$0]  %s1556_s1, 64, %s23_s22, [#allocation4]  }
  0x13   :  { %s1010_s13 = scalar_lea.hbm %s1560_s5, 1024 }
  0x14   :  { %p1011_p8 = scmp.ne.s32.totalorder %s1560_s5, %s1010_s13  ;;  %p1014_p9 = scmp.lt.u32.totalorder %s1010_s13, %s1560_s5 }
  0x16   :  { %p1016_p10 = pnand %p1014_p9, %p1011_p8 }
  0x18   :  { %1019 = shalt.err (!%p1016_p10)
}
  0x19   :  { %s1020_s18 = scalar_lea.vmem %s1148_s24, 1024  ;;  %p1025_p12 = scmp.lt.s32.totalorder %s1148_s24, %s1148_s24 }
  0x1a   :  { %p1021_p11 = scmp.ne.s32.totalorder %s1148_s24, %s1020_s18  ;;  %p1026_p13 = scmp.lt.s32.totalorder %s1020_s18, %s1020_s18 }
  0x1c   :  { %p1027_p0 = por %p1026_p13, %p1025_p12 }
  0x1e   :  { %p1028_p1 = pnand %p1027_p0, %p1021_p11 }
  0x20   :  { %1031 = shalt.err (!%p1028_p1)
}
  0x21   :  { %s1062_s1 = smov 256   ;;  %s1063_s19 = smov 16  }
  0x22   :  { %43 = dma.hbm_to_vmem [thread:$0]  %s1560_s5, 1024, %s1148_s24, [#allocation7], %s1062_s1, %s1062_s1, %s1063_s19  }
  0x23   :  { %1054 = dma.done.wait [#allocation4], 64  }
  0x24   :  { %1055 = vsyncadd [#allocation4], 4294967232 }
  0x25   :  { %1056 = dma.done.wait [#allocation7], 1024  }
  0x26   :  { %1057 = vsyncadd [#allocation7], 4294966272  ;;  %v1064_v0 = vmov 0   ;;  %v1065_v1 = vmov 2   ;;  %v52_v2 = vld [vmem:[#allocation3] sm:$0xf]  ;;  %v67_v26 = vlaneseq }
  0x27   :  { %942 = vset.pattern.permute.xlu0 %v1064_v0  ;;  %943 = vset.pattern.permute.xlu1 %v1065_v1  ;;  %v1186_v3 = vld [vmem:[%s1558_s3] sm:$0xff]  ;;  %v1066_v4 = vmov 12   ;;  %v1067_v5 = vmov 3   ;;  %v1068_v7 = vmov 1   ;;  %v1069_v8 = vmov 4   ;;  %v51_v33 = vld [vmem:[%s1555_s0 + $0x8] sm:$0xff] }
  0x28   :  { %64 = vperm.xlu0 %942, %v52_v2   ;;  %94 = vperm.xlu1 %943, %v52_v2   ;;  %v183_v6 = vld [vmem:[%s1557_s2] sm:$0xff]  ;;  %v1070_v9 = vmov 5   ;;  %v1071_v10 = vmov 7   ;;  %v1072_v11 = vmov 6   ;;  %v1073_v12 = vmov 9   ;;  %s1089_s27 = smov 33  }
  0x29   :  { %v1074_v13 = vmov 8   ;;  %v1075_v14 = vmov 10   ;;  %v1076_v15 = vmov 11   ;;  %v1077_v16 = vmov 13   ;;  %v50_v32 = vld [vmem:[%s1555_s0] sm:$0xff]  ;;  %s1087_s0 = smov 34  }
  0x2a   :  { %v1078_v17 = vmov 14   ;;  %v1079_v18 = vmov 15   ;;  %v1080_v19 = vmov 16   ;;  %v1081_v20 = vmov 17   ;;  %s1091_s28 = smov 32   ;;  %s1092_s29 = smov 94  }
  0x2b   :  { %v1082_v21 = vmov 18   ;;  %v1083_v22 = vmov 19   ;;  %v1084_v23 = vmov 20   ;;  %v1085_v24 = vmov 21   ;;  %s1093_s30 = smov 31   ;;  %s1094_s7 = smov 30  }
  0x2c   :  { %946 = vset.pattern.permute.xlu0 %v1066_v4  ;;  %944 = vset.pattern.permute.xlu1 %v1067_v5  ;;  %v1086_v25 = vmov 22   ;;  %v68_v28 = vshrl.u32 %v67_v26, 7  ;;  %s1095_s8 = smov 18   ;;  %s1096_s11 = smov 17  }
  0x2d   :  { %209 = vperm.xlu0 %946, %v1186_v3   ;;  %110 = vperm.xlu1 %944, %v52_v2   ;;  %s1097_s12 = smov 15   ;;  %s1098_s13 = smov 14  }
  0x2e   :  { %v1218_v30 = vsub.s32 0, %v68_v28  ;;  %v1220_v31 = vsub.s32 4, %v68_v28  ;;  %v1228_v34 = vsub.s32 2, %v68_v28  ;;  %v1230_v35 = vsub.s32 6, %v68_v28  ;;  %s1100_s14 = smov 1   ;;  %s1101_s15 = smov 127  }
  0x2f   :  { %v1232_v37 = vsub.s32 1, %v68_v28  ;;  %v1234_v38 = vsub.s32 5, %v68_v28  ;;  %v1236_v39 = vsub.s32 3, %v68_v28  ;;  %v1238_v40 = vsub.s32 7, %v68_v28  ;;  %s1102_s16 = smov 126   ;;  %s1103_s17 = smov 114  }
  0x30   :  { %v70_v41 = vrot.slane %v50_v32, %v1218_v30  ;;  %v74_v42 = vrot.slane %v51_v33, %v1218_v30  ;;  %v130_v43 = vrot.slane %v50_v32, %v1220_v31  ;;  %v134_v44 = vrot.slane %v51_v33, %v1220_v31  ;;  %s1104_s18 = smov 113   ;;  %s1105_s20 = smov 112  }
  0x31   :  { %947 = vset.pattern.permute.xlu0 %v1064_v0  ;;  %945 = vset.pattern.permute.xlu1 %v1064_v0  ;;  %v100_v46 = vrot.slane %v50_v32, %v1228_v34  ;;  %v104_v47 = vrot.slane %v51_v33, %v1228_v34  ;;  %v152_v48 = vrot.slane %v50_v32, %v1230_v35  ;;  %s1106_s21 = smov 111   ;;  %s1107_s22 = smov 110  }
  0x32   :  { %234 = vperm.xlu0 %947, %v1186_v3   ;;  %186 = vperm.xlu1 %945, %v183_v6   ;;  %v156_v49 = vrot.slane %v51_v33, %v1230_v35  ;;  %v84_v50 = vrot.slane %v50_v32, %v1232_v37  ;;  %v88_v51 = vrot.slane %v51_v33, %v1232_v37  ;;  %s1108_s23 = smov 98   ;;  %s1109_s5 = smov 97  }
  0x33   :  { %v140_v52 = vrot.slane %v50_v32, %v1234_v38  ;;  %v144_v53 = vrot.slane %v51_v33, %v1234_v38  ;;  %v116_v54 = vrot.slane %v50_v32, %v1236_v39  ;;  %v120_v55 = vrot.slane %v51_v33, %v1236_v39  ;;  %s1110_s24 = smov 96   ;;  %s1111_s2 = smov 95  }
  0x34   :  { %v164_v56 = vrot.slane %v50_v32, %v1238_v40  ;;  %v168_v57 = vrot.slane %v51_v33, %v1238_v40  ;;  %s1112_s3 = smov [#allocation8]  }
  0x35   :  { %s874_s25 = sshll.u32 %s1112_s3, 4  ;;  %s875_s25 = int_to_ptr.vmem [resolvable:$true] %s874_s25 }
  0x36   :  { %948 = vset.pattern.permute.xlu0 %v1068_v7  ;;  %953 = vset.pattern.permute.xlu1 %v1072_v11  ;;  %s1032_s26 = scalar_lea.vmem %s875_s25, 512  ;;  %p1037_p3 = scmp.lt.s32.totalorder %s875_s25, %s875_s25 }
  0x37   :  { %78 = vperm.xlu0 %948, %v52_v2   ;;  %384 = vperm.xlu1 %953, %v1186_v3   ;;  %p1033_p2 = scmp.ne.s32.totalorder %s875_s25, %s1032_s26  ;;  %p1038_p4 = scmp.lt.s32.totalorder %s1032_s26, %s1032_s26 }
  0x39   :  { %p1039_p5 = por %p1038_p4, %p1037_p3 }
  0x3b   :  { %259 = vperm.xlu0 %948, %v1186_v3   ;;  %955 = vset.pattern.permute.xlu1 %v1074_v13  ;;  %p1040_p6 = pnand %p1039_p5, %p1033_p2 }
  0x3c   :  { %434 = vperm.xlu1 %955, %v1186_v3  }
  0x3f   :  { %949 = vset.pattern.permute.xlu0 %v1065_v1 }
  0x40   :  { %284 = vperm.xlu0 %949, %v1186_v3  }
  0x44   :  { %950 = vset.pattern.permute.xlu0 %v1067_v5 }
  0x45   :  { %309 = vperm.xlu0 %950, %v1186_v3  }
  0x49   :  { %951 = vset.pattern.permute.xlu0 %v1069_v8 }
  0x4a   :  { %334 = vperm.xlu0 %951, %v1186_v3  }
  0x4e   :  { %952 = vset.pattern.permute.xlu0 %v1070_v9 }
  0x4f   :  { %359 = vperm.xlu0 %952, %v1186_v3  }
  0x53   :  { %954 = vset.pattern.permute.xlu0 %v1071_v10 }
  0x54   :  { %409 = vperm.xlu0 %954, %v1186_v3  }
  0x58   :  { %956 = vset.pattern.permute.xlu0 %v1073_v12 }
  0x59   :  { %459 = vperm.xlu0 %956, %v1186_v3  }
  0x5d   :  { %957 = vset.pattern.permute.xlu0 %v1075_v14 }
  0x5e   :  { %484 = vperm.xlu0 %957, %v1186_v3  }
  0x62   :  { %958 = vset.pattern.permute.xlu0 %v1076_v15 }
  0x63   :  { %509 = vperm.xlu0 %958, %v1186_v3  }
  0x67   :  { %959 = vset.pattern.permute.xlu0 %v1077_v16 }
  0x68   :  { %534 = vperm.xlu0 %959, %v1186_v3  }
  0x6c   :  { %960 = vset.pattern.permute.xlu0 %v1078_v17 }
  0x6d   :  { %559 = vperm.xlu0 %960, %v1186_v3  }
  0x71   :  { %961 = vset.pattern.permute.xlu0 %v1079_v18 }
  0x72   :  { %584 = vperm.xlu0 %961, %v1186_v3  }
  0x76   :  { %962 = vset.pattern.permute.xlu0 %v1080_v19 }
  0x77   :  { %609 = vperm.xlu0 %962, %v1186_v3  }
  0x7b   :  { %963 = vset.pattern.permute.xlu0 %v1081_v20 }
  0x7c   :  { %634 = vperm.xlu0 %963, %v1186_v3  }
  0x80   :  { %964 = vset.pattern.permute.xlu0 %v1082_v21 }
  0x81   :  { %659 = vperm.xlu0 %964, %v1186_v3  }
  0x85   :  { %965 = vset.pattern.permute.xlu0 %v1083_v22 }
  0x86   :  { %684 = vperm.xlu0 %965, %v1186_v3  }
  0x8a   :  { %966 = vset.pattern.permute.xlu0 %v1084_v23 }
  0x8b   :  { %709 = vperm.xlu0 %966, %v1186_v3  }
  0x8f   :  { %967 = vset.pattern.permute.xlu0 %v1085_v24 }
  0x90   :  { %734 = vperm.xlu0 %967, %v1186_v3  }
  0x94   :  { %968 = vset.pattern.permute.xlu0 %v1086_v25 }
  0xa7   :  { %v65_v27 = vpop.permute.xlu0 %64  ;;  %v95_v36 = vpop.permute.xlu1 %94 }
  0xa8   :  { %v75_v58 = vmul.f32 %v70_v41, %v65_v27  ;;  %v76_v59 = vmul.f32 %v74_v42, %v65_v27  ;;  %v135_v60 = vmul.f32 %v130_v43, %v65_v27  ;;  %v136_v61 = vmul.f32 %v134_v44, %v65_v27 }
  0xa9   :  { %v105_v63 = vmul.f32 %v100_v46, %v95_v36  ;;  %v106_v1 = vmul.f32 %v104_v47, %v95_v36  ;;  %v157_v2 = vmul.f32 %v152_v48, %v95_v36  ;;  %v158_v4 = vmul.f32 %v156_v49, %v95_v36 }
  0xac   :  { %v1216_v29 = vpop.permute.xlu0 %209  ;;  %v111_v62 = vpop.permute.xlu1 %110 }
  0xad   :  { %v121_v10 = vmul.f32 %v116_v54, %v111_v62  ;;  %v122_v11 = vmul.f32 %v120_v55, %v111_v62  ;;  %v169_v12 = vmul.f32 %v164_v56, %v111_v62  ;;  %v170_v13 = vmul.f32 %v168_v57, %v111_v62 }
  0xb1   :  { %v1244_v45 = vpop.permute.xlu0 %234  ;;  %v187_v32 = vpop.permute.xlu1 %186 }
  0xb6   :  { %v79_v5 = vpop.permute.xlu0 %78 }
  0xb7   :  { %v89_v6 = vmul.f32 %v84_v50, %v79_v5  ;;  %v90_v7 = vmul.f32 %v88_v51, %v79_v5  ;;  %v145_v8 = vmul.f32 %v140_v52, %v79_v5  ;;  %v146_v9 = vmul.f32 %v144_v53, %v79_v5 }
  0xb9   :  { %v91_v14 = vadd.f32 %v89_v6, %v75_v58  ;;  %v92_v15 = vadd.f32 %v90_v7, %v76_v59  ;;  %v147_v16 = vadd.f32 %v145_v8, %v135_v60  ;;  %v148_v17 = vadd.f32 %v146_v9, %v136_v61  ;;  %v1316_v8 = vpop.permute.xlu1 %384 }
  0xba   :  { %v1088_v58 = vmov 23  }
  0xbb   :  { %v107_v18 = vadd.f32 %v105_v63, %v91_v14  ;;  %v108_v19 = vadd.f32 %v106_v1, %v92_v15  ;;  %v159_v20 = vadd.f32 %v157_v2, %v147_v16  ;;  %v160_v21 = vadd.f32 %v158_v4, %v148_v17  ;;  %v1332_v14 = vld [vmem:[#allocation6 + $0x8] sm:$0xff] }
  0xbc   :  { %v1090_v63 = vmov 24  }
  0xbd   :  { %v123_v22 = vadd.f32 %v121_v10, %v107_v18  ;;  %v124_v23 = vadd.f32 %v122_v11, %v108_v19  ;;  %v171_v24 = vadd.f32 %v169_v12, %v159_v20  ;;  %v172_v25 = vadd.f32 %v170_v13, %v160_v21  ;;  %v1322_v10 = vpop.permute.xlu1 %434  ;;  %v1330_v13 = vld [vmem:[#allocation6] sm:$0xff] }
  0xbe   :  { %v1327_v12 = vand.u32 127, %v67_v26  ;;  %v226_v17 = vrot.slane %v1330_v13, %v1218_v30  ;;  %v230_v26 = vrot.slane %v1332_v14, %v1218_v30 }
  0xbf   :  { %125 = vst [vmem:[#allocation2] sm:$0xf] %v123_v22  ;;  %126 = vst [vmem:[#allocation2 + $0x8] sm:$0xf] %v124_v23  ;;  %v175_v27 = vrot.slane %v171_v24, 4  ;;  %v176_v28 = vrot.slane %v172_v25, 4 }
  0xc0   :  { %vm220_vm0 = vcmp.lt.s32.totalorder %v1327_v12, 34  ;;  %vm245_vm1 = vcmp.lt.s32.totalorder %v1327_v12, 33  ;;  %vm270_vm2 = vcmp.lt.s32.totalorder %v1327_v12, 32  ;;  %vm295_vm3 = vcmp.lt.s32.totalorder %v1327_v12, 31 }
  0xc1   :  { %179 = vst [vmem:[#allocation2] sm:$0xf0] %v175_v27  ;;  %180 = vst [vmem:[#allocation2 + $0x8] sm:$0xf0] %v176_v28  ;;  %vm320_vm4 = vcmp.lt.s32.totalorder %v1327_v12, 30  ;;  %vm345_vm5 = vcmp.lt.s32.totalorder %v1327_v12, 18 }
  0xc2   :  { %vm370_vm6 = vcmp.lt.s32.totalorder %v1327_v12, 17  ;;  %vm395_vm7 = vcmp.lt.s32.totalorder %v1327_v12, 16  ;;  %vm420_vm8 = vcmp.lt.s32.totalorder %v1327_v12, 15  ;;  %vm445_vm9 = vcmp.lt.s32.totalorder %v1327_v12, 14 }
  0xc3   :  { %vm470_vm10 = vcmp.lt.s32.totalorder %v1327_v12, 2  ;;  %vm495_vm11 = vcmp.lt.s32.totalorder %v1327_v12, 1  ;;  %vm520_vm12 = vcmp.lt.s32.totalorder %v1327_v12, 127  ;;  %vm545_vm13 = vcmp.lt.s32.totalorder %v1327_v12, 126 }
  0xc4   :  { %vm570_vm14 = vcmp.lt.s32.totalorder %v1327_v12, 114  ;;  %vm595_vm15 = vcmp.lt.s32.totalorder %v1327_v12, 113 }
  0xc8   :  { %v181_v33 = vld [vmem:[#allocation2] sm:$0xff]  ;;  %v182_v36 = vld [vmem:[#allocation2 + $0x8] sm:$0xff] }
  0xc9   :  { %v189_v41 = vadd.f32 %v187_v32, %v181_v33  ;;  %v190_v42 = vadd.f32 %v187_v32, %v182_v36 }
  0xcb   :  { %v191_v43 = vsub.f32 0.0, %v189_v41  ;;  %v192_v44 = vsub.f32 0.0, %v190_v42 }
  0xcd   :  { %v193_v46 = vmul.f32 1.442695, %v191_v43  ;;  %v195_v47 = vmul.f32 1.442695, %v192_v44 }
  0xcf   :  { %972 = vpow2.f32 %v193_v46 }
  0xd0   :  { %974 = vpow2.f32 %v195_v47 }
  0xd9   :  { %v973_v48 = vpop.eup %972 }
  0xda   :  { %v975_v49 = vpop.eup %974  ;;  %v197_v50 = vadd.f32 1.0, %v973_v48 }
  0xdb   :  { %v198_v51 = vadd.f32 1.0, %v975_v49 }
  0xdc   :  { %976 = vrcp.f32 %v197_v50 }
  0xdd   :  { %978 = vrcp.f32 %v198_v51 }
  0xe6   :  { %v977_v52 = vpop.eup %976 }
  0xe7   :  { %v979_v53 = vpop.eup %978  ;;  %v1258_v54 = vmul.f32 %v977_v52, %v189_v41  ;;  %v251_v41 = vrot.slane %v1330_v13, %v1232_v37 }
  0xe8   :  { %v1260_v55 = vmul.f32 %v979_v53, %v190_v42  ;;  %v255_v42 = vrot.slane %v1332_v14, %v1232_v37  ;;  %v276_v53 = vrot.slane %v1330_v13, %v1228_v34 }
  0xe9   :  { %205 = vst [vmem:[#allocation2] sm:$0xff] %v1258_v54  ;;  %391 = vrot.lane.b32.xlu0 %v1258_v54, %s1063_s19  ;;  %214 = vrot.lane.b32.xlu1 %v1258_v54, %s1087_s0  ;;  %v212_v25 = vmul.f32 %v1216_v29, %v1258_v54 }
  0xea   :  { %206 = vst [vmem:[#allocation2 + $0x8] sm:$0xff] %v1260_v55  ;;  %v213_v24 = vmul.f32 %v1216_v29, %v1260_v55 }
  0xed   :  { %759 = vperm.xlu0 %968, %v1186_v3   ;;  %216 = vrot.lane.b32.xlu1 %v1260_v55, %s1087_s0 }
  0xf0   :  { %v841_v56 = vld [vmem:[#allocation2] sm:$0xf]  ;;  %v855_v57 = vld [vmem:[#allocation2] sm:$0xf0] }
  0xf1   :  { %969 = vset.pattern.permute.xlu0 %v1088_v58  ;;  %241 = vrot.lane.b32.xlu1 %v1258_v54, %s1089_s27  ;;  %v842_v59 = vld [vmem:[#allocation2 + $0x8] sm:$0xf]  ;;  %843 = vst [vmem:[#allocation8] sm:$0xf] %v841_v56  ;;  %v856_v60 = vld [vmem:[#allocation2 + $0x8] sm:$0xf0]  ;;  %v280_v56 = vrot.slane %v1332_v14, %v1228_v34 }
  0xf2   :  { %v859_v61 = vrot.slane %v855_v57, 4  ;;  %784 = vperm.xlu0 %969, %v1186_v3   ;;  %844 = vst [vmem:[#allocation8 + $0x8] sm:$0xf] %v842_v59  ;;  %v860_v62 = vrot.slane %v856_v60, 4 }
  0xf4   :  { %863 = vst [vmem:[#allocation8 + $0x10] sm:$0xf] %v859_v61  ;;  %864 = vst [vmem:[#allocation8 + $0x18] sm:$0xf] %v860_v62 }
  0xf5   :  { %243 = vrot.lane.b32.xlu1 %v1260_v55, %s1089_s27 }
  0xf6   :  { %970 = vset.pattern.permute.xlu0 %v1090_v63 }
  0xf7   :  { %809 = vperm.xlu0 %970, %v1186_v3   ;;  %v1292_v3 = vpop.permute.xlu0 %259 }
  0xf9   :  { %266 = vrot.lane.b32.xlu1 %v1258_v54, %s1091_s28 }
  0xfb   :  { %791 = vrot.lane.b32.xlu0 %v1258_v54, %s1092_s29  ;;  %v1295_v1 = vpop.permute.xlu0 %284 }
  0xfc   :  { %971 = vset.pattern.permute.xlu0 %v1064_v0  ;;  %v816_v0 = vld [vmem:[%s1559_s4] sm:$0xff]  ;;  %s1099_s4 = smov 2  }
  0xfd   :  { %268 = vrot.lane.b32.xlu1 %v1260_v55, %s1091_s28 }
  0xff   :  { %819 = vperm.xlu0 %971, %v816_v0   ;;  %v1299_v2 = vpop.permute.xlu0 %309 }
 0x101   :  { %291 = vrot.lane.b32.xlu1 %v1258_v54, %s1093_s30 }
 0x103   :  { %v1302_v4 = vpop.permute.xlu0 %334 }
 0x105   :  { %293 = vrot.lane.b32.xlu1 %v1260_v55, %s1093_s30 }
 0x107   :  { %v1306_v5 = vpop.permute.xlu0 %359 }
 0x109   :  { %316 = vrot.lane.b32.xlu1 %v1258_v54, %s1094_s7 }
 0x10b   :  { %v1309_v6 = vpop.permute.xlu0 %409 }
 0x10d   :  { %318 = vrot.lane.b32.xlu1 %v1260_v55, %s1094_s7 }
 0x10f   :  { %v1313_v7 = vpop.permute.xlu0 %459 }
 0x111   :  { %341 = vrot.lane.b32.xlu1 %v1258_v54, %s1095_s8 }
 0x113   :  { %v1318_v9 = vpop.permute.xlu0 %484 }
 0x115   :  { %343 = vrot.lane.b32.xlu1 %v1260_v55, %s1095_s8 }
 0x117   :  { %v1324_v11 = vpop.permute.xlu0 %509 }
 0x119   :  { %366 = vrot.lane.b32.xlu1 %v1258_v54, %s1096_s11 }
 0x11b   :  { %v1334_v16 = vpop.permute.xlu0 %534 }
 0x11d   :  { %368 = vrot.lane.b32.xlu1 %v1260_v55, %s1096_s11 }
 0x11f   :  { %v1343_v23 = vpop.permute.xlu0 %559 }
 0x121   :  { %393 = vrot.lane.b32.xlu1 %v1260_v55, %s1063_s19 }
 0x123   :  { %v1357_v46 = vpop.permute.xlu0 %584 }
 0x125   :  { %416 = vrot.lane.b32.xlu1 %v1258_v54, %s1097_s12 }
 0x127   :  { %v1368_v57 = vpop.permute.xlu0 %609 }
 0x129   :  { %418 = vrot.lane.b32.xlu1 %v1260_v55, %s1097_s12 }
 0x12d   :  { %441 = vrot.lane.b32.xlu1 %v1258_v54, %s1098_s13 }
 0x131   :  { %443 = vrot.lane.b32.xlu1 %v1260_v55, %s1098_s13 }
 0x135   :  { %466 = vrot.lane.b32.xlu1 %v1258_v54, %s1099_s4 }
 0x139   :  { %468 = vrot.lane.b32.xlu1 %v1260_v55, %s1099_s4 }
 0x13d   :  { %491 = vrot.lane.b32.xlu1 %v1258_v54, %s1100_s14 }
 0x141   :  { %493 = vrot.lane.b32.xlu1 %v1260_v55, %s1100_s14 }
 0x145   :  { %516 = vrot.lane.b32.xlu1 %v1258_v54, %s1101_s15 }
 0x149   :  { %518 = vrot.lane.b32.xlu1 %v1260_v55, %s1101_s15 }
 0x14d   :  { %541 = vrot.lane.b32.xlu1 %v1258_v54, %s1102_s16 }
 0x151   :  { %543 = vrot.lane.b32.xlu1 %v1260_v55, %s1102_s16 }
 0x155   :  { %566 = vrot.lane.b32.xlu1 %v1258_v54, %s1103_s17 }
 0x159   :  { %568 = vrot.lane.b32.xlu1 %v1260_v55, %s1103_s17 }
 0x15b   :  { %v215_v15 = vpop.permute.xlu1 %214 }
 0x15d   :  { %591 = vrot.lane.b32.xlu1 %v1258_v54, %s1104_s18 }
 0x15f   :  { %v217_v18 = vpop.permute.xlu1 %216 }
 0x160   :  { %v221_v19 = vsel %vm220_vm0, %v215_v15, %v217_v18  ;;  %v222_v20 = vsel %vm220_vm0, %v217_v18, %v215_v15  ;;  %v1374_v15 = vpop.permute.xlu0 %634  ;;  %v301_v18 = vrot.slane %v1330_v13, %v1236_v39  ;;  %vm620_vm0 = vcmp.lt.s32.totalorder %v1327_v12, 112 }
 0x161   :  { %v231_v21 = vmul.f32 %v226_v17, %v222_v20  ;;  %v232_v22 = vmul.f32 %v230_v26, %v221_v19  ;;  %593 = vrot.lane.b32.xlu1 %v1260_v55, %s1104_s18  ;;  %v305_v19 = vrot.slane %v1332_v14, %v1236_v39 }
 0x163   :  { %v237_v27 = vmul.f32 %v1244_v45, %v231_v21  ;;  %v238_v28 = vmul.f32 %v1244_v45, %v232_v22  ;;  %v242_v32 = vpop.permute.xlu1 %241 }
 0x165   :  { %v239_v33 = vadd.f32 %v237_v27, %v212_v25  ;;  %v240_v36 = vadd.f32 %v238_v28, %v213_v24  ;;  %616 = vrot.lane.b32.xlu1 %v1258_v54, %s1105_s20  ;;  %v1382_v25 = vpop.permute.xlu0 %659 }
 0x167   :  { %v244_v43 = vpop.permute.xlu1 %243 }
 0x168   :  { %v246_v29 = vsel %vm245_vm1, %v242_v32, %v244_v43  ;;  %v247_v44 = vsel %vm245_vm1, %v244_v43, %v242_v32  ;;  %vm645_vm1 = vcmp.lt.s32.totalorder %v1327_v12, 111 }
 0x169   :  { %v256_v45 = vmul.f32 %v251_v41, %v247_v44  ;;  %v257_v47 = vmul.f32 %v255_v42, %v246_v29  ;;  %618 = vrot.lane.b32.xlu1 %v1260_v55, %s1105_s20  ;;  %v326_v41 = vrot.slane %v1330_v13, %v1220_v31  ;;  %v330_v42 = vrot.slane %v1332_v14, %v1220_v31 }
 0x16b   :  { %v262_v48 = vmul.f32 %v1292_v3, %v256_v45  ;;  %v263_v49 = vmul.f32 %v1292_v3, %v257_v47  ;;  %v267_v50 = vpop.permute.xlu1 %266  ;;  %v1392_v45 = vpop.permute.xlu0 %684 }
 0x16d   :  { %v264_v51 = vadd.f32 %v262_v48, %v239_v33  ;;  %v265_v52 = vadd.f32 %v263_v49, %v240_v36  ;;  %641 = vrot.lane.b32.xlu1 %v1258_v54, %s1106_s21 }
 0x16f   :  { %v269_v58 = vpop.permute.xlu1 %268 }
 0x170   :  { %v271_v59 = vsel %vm270_vm2, %v267_v50, %v269_v58  ;;  %v272_v60 = vsel %vm270_vm2, %v269_v58, %v267_v50  ;;  %v1403_v58 = vpop.permute.xlu0 %709  ;;  %vm670_vm2 = vcmp.lt.s32.totalorder %v1327_v12, 110 }
 0x171   :  { %v281_v61 = vmul.f32 %v276_v53, %v272_v60  ;;  %v282_v62 = vmul.f32 %v280_v56, %v271_v59  ;;  %643 = vrot.lane.b32.xlu1 %v1260_v55, %s1106_s21  ;;  %v351_v53 = vrot.slane %v1330_v13, %v1234_v38  ;;  %v355_v56 = vrot.slane %v1332_v14, %v1234_v38 }
 0x173   :  { %v287_v63 = vmul.f32 %v1295_v1, %v281_v61  ;;  %v288_v0 = vmul.f32 %v1295_v1, %v282_v62  ;;  %v292_v3 = vpop.permute.xlu1 %291 }
 0x175   :  { %v289_v17 = vadd.f32 %v287_v63, %v264_v51  ;;  %v290_v26 = vadd.f32 %v288_v0, %v265_v52  ;;  %666 = vrot.lane.b32.xlu1 %v1258_v54, %s1107_s22 }
 0x177   :  { %v294_v20 = vpop.permute.xlu1 %293 }
 0x178   :  { %v296_v21 = vsel %vm295_vm3, %v292_v3, %v294_v20  ;;  %v297_v22 = vsel %vm295_vm3, %v294_v20, %v292_v3  ;;  %v380_v20 = vrot.slane %v1332_v14, %v1230_v35  ;;  %vm695_vm3 = vcmp.lt.s32.totalorder %v1327_v12, 98 }
 0x179   :  { %v306_v1 = vmul.f32 %v301_v18, %v297_v22  ;;  %v307_v24 = vmul.f32 %v305_v19, %v296_v21  ;;  %668 = vrot.lane.b32.xlu1 %v1260_v55, %s1107_s22  ;;  %v376_v19 = vrot.slane %v1330_v13, %v1230_v35 }
 0x17b   :  { %v312_v27 = vmul.f32 %v1299_v2, %v306_v1  ;;  %v313_v28 = vmul.f32 %v1299_v2, %v307_v24  ;;  %v317_v32 = vpop.permute.xlu1 %316 }
 0x17d   :  { %v314_v33 = vadd.f32 %v312_v27, %v289_v17  ;;  %v315_v36 = vadd.f32 %v313_v28, %v290_v26  ;;  %691 = vrot.lane.b32.xlu1 %v1258_v54, %s1108_s23  ;;  %v1409_v17 = vpop.permute.xlu0 %734  ;;  %v401_v27 = vrot.slane %v1330_v13, %v1238_v40  ;;  %v405_v28 = vrot.slane %v1332_v14, %v1238_v40  ;;  %v1427_v13 = vld [vmem:[#allocation6 + $0x18] sm:$0xff] }
 0x17f   :  { %v319_v43 = vpop.permute.xlu1 %318 }
 0x180   :  { %v321_v29 = vsel %vm320_vm4, %v317_v32, %v319_v43  ;;  %v322_v44 = vsel %vm320_vm4, %v319_v43, %v317_v32  ;;  %vm720_vm4 = vcmp.lt.s32.totalorder %v1327_v12, 97 }
 0x181   :  { %v331_v2 = vmul.f32 %v326_v41, %v322_v44  ;;  %v332_v47 = vmul.f32 %v330_v42, %v321_v29  ;;  %693 = vrot.lane.b32.xlu1 %v1260_v55, %s1108_s23  ;;  %v392_v32 = vpop.permute.xlu0 %391 }
 0x183   :  { %v337_v48 = vmul.f32 %v1302_v4, %v331_v2  ;;  %v338_v49 = vmul.f32 %v1302_v4, %v332_v47  ;;  %v342_v50 = vpop.permute.xlu1 %341 }
 0x185   :  { %v339_v51 = vadd.f32 %v337_v48, %v314_v33  ;;  %v340_v52 = vadd.f32 %v338_v49, %v315_v36  ;;  %716 = vrot.lane.b32.xlu1 %v1258_v54, %s1109_s5  ;;  %v1425_v48 = vld [vmem:[#allocation6 + $0x10] sm:$0xff] }
 0x187   :  { %v344_v59 = vpop.permute.xlu1 %343 }
 0x188   :  { %v346_v60 = vsel %vm345_vm5, %v342_v50, %v344_v59  ;;  %v347_v61 = vsel %vm345_vm5, %v344_v59, %v342_v50  ;;  %vm745_vm5 = vcmp.lt.s32.totalorder %v1327_v12, 96 }
 0x189   :  { %v356_v4 = vmul.f32 %v351_v53, %v347_v61  ;;  %v357_v62 = vmul.f32 %v355_v56, %v346_v60  ;;  %718 = vrot.lane.b32.xlu1 %v1260_v55, %s1109_s5 }
 0x18b   :  { %v362_v63 = vmul.f32 %v1306_v5, %v356_v4  ;;  %v363_v0 = vmul.f32 %v1306_v5, %v357_v62  ;;  %v367_v3 = vpop.permute.xlu1 %366 }
 0x18d   :  { %v364_v26 = vadd.f32 %v362_v63, %v339_v51  ;;  %v365_v18 = vadd.f32 %v363_v0, %v340_v52  ;;  %741 = vrot.lane.b32.xlu1 %v1258_v54, %s1110_s24  ;;  %v426_v52 = vrot.slane %v1425_v48, %v1218_v30 }
 0x18f   :  { %v369_v21 = vpop.permute.xlu1 %368 }
 0x190   :  { %v371_v22 = vsel %vm370_vm6, %v367_v3, %v369_v21  ;;  %v372_v1 = vsel %vm370_vm6, %v369_v21, %v367_v3  ;;  %v451_v3 = vrot.slane %v1425_v48, %v1232_v37  ;;  %vm770_vm6 = vcmp.lt.s32.totalorder %v1327_v12, 95 }
 0x191   :  { %v381_v5 = vmul.f32 %v376_v19, %v372_v1  ;;  %v382_v24 = vmul.f32 %v380_v20, %v371_v22  ;;  %743 = vrot.lane.b32.xlu1 %v1260_v55, %s1110_s24 }
 0x193   :  { %v387_v33 = vmul.f32 %v1316_v8, %v381_v5  ;;  %v388_v36 = vmul.f32 %v1316_v8, %v382_v24  ;;  %v394_v41 = vpop.permute.xlu1 %393 }
 0x194   :  { %v396_v42 = vsel %vm395_vm7, %v392_v32, %v394_v41  ;;  %v397_v43 = vsel %vm395_vm7, %v394_v41, %v392_v32  ;;  %vm795_vm7 = vcmp.lt.s32.totalorder %v1327_v12, 94 }
 0x195   :  { %v389_v29 = vadd.f32 %v387_v33, %v364_v26  ;;  %v390_v44 = vadd.f32 %v388_v36, %v365_v18  ;;  %v406_v2 = vmul.f32 %v401_v27, %v397_v43  ;;  %v407_v47 = vmul.f32 %v405_v28, %v396_v42  ;;  %766 = vrot.lane.b32.xlu1 %v1258_v54, %s1111_s2 }
 0x196   :  { %v430_v54 = vrot.slane %v1427_v13, %v1218_v30  ;;  %v455_v26 = vrot.slane %v1427_v13, %v1232_v37  ;;  %v476_v27 = vrot.slane %v1425_v48, %v1228_v34  ;;  %v480_v28 = vrot.slane %v1427_v13, %v1228_v34 }
 0x197   :  { %v412_v14 = vmul.f32 %v1309_v6, %v406_v2  ;;  %v413_v49 = vmul.f32 %v1309_v6, %v407_v47  ;;  %v417_v50 = vpop.permute.xlu1 %416  ;;  %v501_v47 = vrot.slane %v1425_v48, %v1236_v39 }
 0x199   :  { %v414_v8 = vadd.f32 %v412_v14, %v389_v29  ;;  %v415_v51 = vadd.f32 %v413_v49, %v390_v44  ;;  %768 = vrot.lane.b32.xlu1 %v1260_v55, %s1111_s2  ;;  %v505_v14 = vrot.slane %v1427_v13, %v1236_v39 }
 0x19b   :  { %v419_v53 = vpop.permute.xlu1 %418 }
 0x19c   :  { %v421_v56 = vsel %vm420_vm8, %v417_v50, %v419_v53  ;;  %v422_v59 = vsel %vm420_vm8, %v419_v53, %v417_v50 }
 0x19d   :  { %v431_v60 = vmul.f32 %v426_v52, %v422_v59  ;;  %v432_v61 = vmul.f32 %v430_v54, %v421_v56  ;;  %793 = vrot.lane.b32.xlu1 %v1260_v55, %s1092_s29 }
 0x19f   :  { %v437_v6 = vmul.f32 %v1322_v10, %v431_v60  ;;  %v438_v4 = vmul.f32 %v1322_v10, %v432_v61  ;;  %v442_v62 = vpop.permute.xlu1 %441  ;;  %v526_v60 = vrot.slane %v1425_v48, %v1234_v38  ;;  %v530_v61 = vrot.slane %v1427_v13, %v1234_v38 }
 0x1a1   :  { %v439_v63 = vadd.f32 %v437_v6, %v414_v8  ;;  %v440_v0 = vadd.f32 %v438_v4, %v415_v51 }
 0x1a3   :  { %v444_v18 = vpop.permute.xlu1 %443 }
 0x1a4   :  { %v446_v19 = vsel %vm445_vm9, %v442_v62, %v444_v18  ;;  %v447_v20 = vsel %vm445_vm9, %v444_v18, %v442_v62 }
 0x1a5   :  { %v456_v21 = vmul.f32 %v451_v3, %v447_v20  ;;  %v457_v55 = vmul.f32 %v455_v26, %v446_v19  ;;  %v551_v20 = vrot.slane %v1425_v48, %v1230_v35 }
 0x1a7   :  { %v462_v22 = vmul.f32 %v1313_v7, %v456_v21  ;;  %v463_v10 = vmul.f32 %v1313_v7, %v457_v55  ;;  %v467_v1 = vpop.permute.xlu1 %466  ;;  %v555_v21 = vrot.slane %v1427_v13, %v1230_v35 }
 0x1a9   :  { %v464_v5 = vadd.f32 %v462_v22, %v439_v63  ;;  %v465_v24 = vadd.f32 %v463_v10, %v440_v0 }
 0x1ab   :  { %v469_v32 = vpop.permute.xlu1 %468 }
 0x1ac   :  { %v471_v33 = vsel %vm470_vm10, %v467_v1, %v469_v32  ;;  %v472_v36 = vsel %vm470_vm10, %v469_v32, %v467_v1 }
 0x1ad   :  { %v481_v41 = vmul.f32 %v476_v27, %v472_v36  ;;  %v482_v42 = vmul.f32 %v480_v28, %v471_v33  ;;  %v576_v33 = vrot.slane %v1425_v48, %v1238_v40  ;;  %v580_v36 = vrot.slane %v1427_v13, %v1238_v40 }
 0x1af   :  { %v487_v43 = vmul.f32 %v1318_v9, %v481_v41  ;;  %v488_v7 = vmul.f32 %v1318_v9, %v482_v42  ;;  %v492_v29 = vpop.permute.xlu1 %491 }
 0x1b1   :  { %v489_v44 = vadd.f32 %v487_v43, %v464_v5  ;;  %v490_v2 = vadd.f32 %v488_v7, %v465_v24 }
 0x1b3   :  { %v494_v49 = vpop.permute.xlu1 %493 }
 0x1b4   :  { %v496_v50 = vsel %vm495_vm11, %v492_v29, %v494_v49  ;;  %v497_v8 = vsel %vm495_vm11, %v494_v49, %v492_v29 }
 0x1b5   :  { %v506_v51 = vmul.f32 %v501_v47, %v497_v8  ;;  %v507_v52 = vmul.f32 %v505_v14, %v496_v50 }
 0x1b7   :  { %v512_v54 = vmul.f32 %v1324_v11, %v506_v51  ;;  %v513_v9 = vmul.f32 %v1324_v11, %v507_v52  ;;  %v517_v53 = vpop.permute.xlu1 %516 }
 0x1b9   :  { %v514_v56 = vadd.f32 %v512_v54, %v489_v44  ;;  %v515_v59 = vadd.f32 %v513_v9, %v490_v2  ;;  %v1481_v44 = vld [vmem:[#allocation6 + $0x20] sm:$0xff]  ;;  %v1483_v2 = vld [vmem:[#allocation6 + $0x28] sm:$0xff] }
 0x1ba   :  { %v601_v13 = vrot.slane %v1481_v44, %v1218_v30  ;;  %v605_v50 = vrot.slane %v1483_v2, %v1218_v30  ;;  %v630_v30 = vrot.slane %v1483_v2, %v1232_v37 }
 0x1bb   :  { %v519_v6 = vpop.permute.xlu1 %518 }
 0x1bc   :  { %v521_v4 = vsel %vm520_vm12, %v517_v53, %v519_v6  ;;  %v522_v62 = vsel %vm520_vm12, %v519_v6, %v517_v53 }
 0x1bd   :  { %v531_v63 = vmul.f32 %v526_v60, %v521_v4  ;;  %v532_v0 = vmul.f32 %v530_v61, %v522_v62  ;;  %v626_v61 = vrot.slane %v1481_v44, %v1232_v37  ;;  %v655_v37 = vrot.slane %v1483_v2, %v1228_v34 }
 0x1bf   :  { %v537_v3 = vmul.f32 %v1334_v16, %v531_v63  ;;  %v538_v11 = vmul.f32 %v1334_v16, %v532_v0  ;;  %v542_v26 = vpop.permute.xlu1 %541 }
 0x1c1   :  { %v539_v18 = vadd.f32 %v537_v3, %v514_v56  ;;  %v540_v19 = vadd.f32 %v538_v11, %v515_v59 }
 0x1c3   :  { %v544_v55 = vpop.permute.xlu1 %543 }
 0x1c4   :  { %v546_v22 = vsel %vm545_vm13, %v542_v26, %v544_v55  ;;  %v547_v10 = vsel %vm545_vm13, %v544_v55, %v542_v26 }
 0x1c5   :  { %v556_v1 = vmul.f32 %v551_v20, %v546_v22  ;;  %v557_v5 = vmul.f32 %v555_v21, %v547_v10 }
 0x1c7   :  { %v562_v24 = vmul.f32 %v1343_v23, %v556_v1  ;;  %v563_v16 = vmul.f32 %v1343_v23, %v557_v5  ;;  %v567_v27 = vpop.permute.xlu1 %566 }
 0x1c9   :  { %v564_v28 = vadd.f32 %v562_v24, %v539_v18  ;;  %v565_v32 = vadd.f32 %v563_v16, %v540_v19  ;;  %v651_v19 = vrot.slane %v1481_v44, %v1228_v34  ;;  %v680_v34 = vrot.slane %v1483_v2, %v1236_v39 }
 0x1cb   :  { %v569_v41 = vpop.permute.xlu1 %568 }
 0x1cc   :  { %v571_v42 = vsel %vm570_vm14, %v567_v27, %v569_v41  ;;  %v572_v43 = vsel %vm570_vm14, %v569_v41, %v567_v27  ;;  %v676_v27 = vrot.slane %v1481_v44, %v1236_v39  ;;  %v705_v39 = vrot.slane %v1483_v2, %v1220_v31 }
 0x1cd   :  { %v581_v7 = vmul.f32 %v576_v33, %v571_v42  ;;  %v582_v29 = vmul.f32 %v580_v36, %v572_v43 }
 0x1cf   :  { %v587_v23 = vmul.f32 %v1357_v46, %v581_v7  ;;  %v588_v47 = vmul.f32 %v1357_v46, %v582_v29  ;;  %v592_v14 = vpop.permute.xlu1 %591 }
 0x1d1   :  { %v589_v48 = vadd.f32 %v587_v23, %v564_v28  ;;  %v590_v49 = vadd.f32 %v588_v47, %v565_v32  ;;  %v701_v23 = vrot.slane %v1481_v44, %v1220_v31  ;;  %v730_v31 = vrot.slane %v1483_v2, %v1234_v38 }
 0x1d3   :  { %v594_v8 = vpop.permute.xlu1 %593 }
 0x1d4   :  { %v596_v51 = vsel %vm595_vm15, %v592_v14, %v594_v8  ;;  %v597_v52 = vsel %vm595_vm15, %v594_v8, %v592_v14 }
 0x1d5   :  { %v606_v54 = vmul.f32 %v601_v13, %v596_v51  ;;  %v607_v9 = vmul.f32 %v605_v50, %v597_v52 }
 0x1d7   :  { %v612_v53 = vmul.f32 %v1368_v57, %v606_v54  ;;  %v613_v46 = vmul.f32 %v1368_v57, %v607_v9  ;;  %v617_v56 = vpop.permute.xlu1 %616  ;;  %v726_v54 = vrot.slane %v1481_v44, %v1234_v38  ;;  %v755_v38 = vrot.slane %v1483_v2, %v1230_v35 }
 0x1d9   :  { %v614_v59 = vadd.f32 %v612_v53, %v589_v48  ;;  %v615_v60 = vadd.f32 %v613_v46, %v590_v49 }
 0x1db   :  { %v619_v6 = vpop.permute.xlu1 %618 }
 0x1dc   :  { %v621_v4 = vsel %vm620_vm0, %v617_v56, %v619_v6  ;;  %v622_v62 = vsel %vm620_vm0, %v619_v6, %v617_v56  ;;  %v760_v56 = vpop.permute.xlu0 %759 }
 0x1dd   :  { %v631_v63 = vmul.f32 %v626_v61, %v621_v4  ;;  %v632_v0 = vmul.f32 %v630_v30, %v622_v62  ;;  %v751_v62 = vrot.slane %v1481_v44, %v1230_v35 }
 0x1df   :  { %v637_v3 = vmul.f32 %v1374_v15, %v631_v63  ;;  %v638_v57 = vmul.f32 %v1374_v15, %v632_v0  ;;  %v642_v11 = vpop.permute.xlu1 %641 }
 0x1e0   :  { %v785_v63 = vpop.permute.xlu0 %784 }
 0x1e1   :  { %v639_v26 = vadd.f32 %v637_v3, %v614_v59  ;;  %v640_v18 = vadd.f32 %v638_v57, %v615_v60 }
 0x1e3   :  { %v644_v20 = vpop.permute.xlu1 %643 }
 0x1e4   :  { %v646_v21 = vsel %vm645_vm1, %v642_v11, %v644_v20  ;;  %v647_v55 = vsel %vm645_vm1, %v644_v20, %v642_v11  ;;  %v776_v20 = vrot.slane %v1481_v44, %v1238_v40 }
 0x1e5   :  { %v656_v22 = vmul.f32 %v651_v19, %v646_v21  ;;  %v657_v10 = vmul.f32 %v655_v37, %v647_v55  ;;  %v810_v37 = vpop.permute.xlu0 %809  ;;  %v780_v21 = vrot.slane %v1483_v2, %v1238_v40 }
 0x1e7   :  { %v662_v1 = vmul.f32 %v1382_v25, %v656_v22  ;;  %v663_v15 = vmul.f32 %v1382_v25, %v657_v10  ;;  %v667_v5 = vpop.permute.xlu1 %666 }
 0x1e9   :  { %v664_v24 = vadd.f32 %v662_v1, %v639_v26  ;;  %v665_v16 = vadd.f32 %v663_v15, %v640_v18 }
 0x1eb   :  { %v669_v28 = vpop.permute.xlu1 %668 }
 0x1ec   :  { %v671_v32 = vsel %vm670_vm2, %v667_v5, %v669_v28  ;;  %v672_v33 = vsel %vm670_vm2, %v669_v28, %v667_v5 }
 0x1ed   :  { %v681_v36 = vmul.f32 %v676_v27, %v671_v32  ;;  %v682_v41 = vmul.f32 %v680_v34, %v672_v33  ;;  %v792_v27 = vpop.permute.xlu0 %791 }
 0x1ef   :  { %v687_v42 = vmul.f32 %v1392_v45, %v681_v36  ;;  %v688_v25 = vmul.f32 %v1392_v45, %v682_v41  ;;  %v692_v43 = vpop.permute.xlu1 %691 }
 0x1f1   :  { %v689_v7 = vadd.f32 %v687_v42, %v664_v24  ;;  %v690_v29 = vadd.f32 %v688_v25, %v665_v16  ;;  %v887_v24 = vld [vmem:[#allocation6 + $0x30] ss:$0 sm:$0xff]  ;;  %v888_v16 = vld [vmem:[#allocation6 + $0x38] ss:$0 sm:$0xff] }
 0x1f3   :  { %v694_v47 = vpop.permute.xlu1 %693 }
 0x1f4   :  { %v696_v14 = vsel %vm695_vm3, %v692_v43, %v694_v47  ;;  %v697_v48 = vsel %vm695_vm3, %v694_v47, %v692_v43  ;;  %v820_v43 = vpop.permute.xlu0 %819 }
 0x1f5   :  { %v706_v49 = vmul.f32 %v701_v23, %v696_v14  ;;  %v707_v13 = vmul.f32 %v705_v39, %v697_v48 }
 0x1f7   :  { %v712_v50 = vmul.f32 %v1403_v58, %v706_v49  ;;  %v713_v45 = vmul.f32 %v1403_v58, %v707_v13  ;;  %v717_v8 = vpop.permute.xlu1 %716 }
 0x1f9   :  { %v714_v51 = vadd.f32 %v712_v50, %v689_v7  ;;  %v715_v52 = vadd.f32 %v713_v45, %v690_v29 }
 0x1fb   :  { %v719_v9 = vpop.permute.xlu1 %718 }
 0x1fc   :  { %v721_v53 = vsel %vm720_vm4, %v717_v8, %v719_v9  ;;  %v722_v46 = vsel %vm720_vm4, %v719_v9, %v717_v8 }
 0x1fd   :  { %v731_v59 = vmul.f32 %v726_v54, %v721_v53  ;;  %v732_v60 = vmul.f32 %v730_v31, %v722_v46 }
 0x1ff   :  { %v737_v61 = vmul.f32 %v1409_v17, %v731_v59  ;;  %v738_v58 = vmul.f32 %v1409_v17, %v732_v60  ;;  %v742_v30 = vpop.permute.xlu1 %741 }
 0x201   :  { %v739_v6 = vadd.f32 %v737_v61, %v714_v51  ;;  %v740_v4 = vadd.f32 %v738_v58, %v715_v52 }
 0x203   :  { %v744_v0 = vpop.permute.xlu1 %743 }
 0x204   :  { %v746_v3 = vsel %vm745_vm5, %v742_v30, %v744_v0  ;;  %v747_v57 = vsel %vm745_vm5, %v744_v0, %v742_v30 }
 0x205   :  { %v756_v11 = vmul.f32 %v751_v62, %v746_v3  ;;  %v757_v26 = vmul.f32 %v755_v38, %v747_v57 }
 0x207   :  { %v762_v18 = vmul.f32 %v760_v56, %v756_v11  ;;  %v763_v19 = vmul.f32 %v760_v56, %v757_v26  ;;  %v767_v17 = vpop.permute.xlu1 %766 }
 0x209   :  { %v764_v55 = vadd.f32 %v762_v18, %v739_v6  ;;  %v765_v35 = vadd.f32 %v763_v19, %v740_v4 }
 0x20b   :  { %v769_v22 = vpop.permute.xlu1 %768 }
 0x20c   :  { %v771_v10 = vsel %vm770_vm6, %v767_v17, %v769_v22  ;;  %v772_v1 = vsel %vm770_vm6, %v769_v22, %v767_v17 }
 0x20d   :  { %v781_v15 = vmul.f32 %v776_v20, %v771_v10  ;;  %v782_v5 = vmul.f32 %v780_v21, %v772_v1 }
 0x20f   :  { %v787_v34 = vmul.f32 %v785_v63, %v781_v15  ;;  %v788_v28 = vmul.f32 %v785_v63, %v782_v5  ;;  %v794_v32 = vpop.permute.xlu1 %793 }
 0x210   :  { %v796_v33 = vsel %vm795_vm7, %v792_v27, %v794_v32  ;;  %v797_v44 = vsel %vm795_vm7, %v794_v32, %v792_v27 }
 0x211   :  { %v806_v36 = vmul.f32 %v887_v24, %v796_v33  ;;  %v807_v41 = vmul.f32 %v888_v16, %v797_v44  ;;  %v789_v40 = vadd.f32 %v787_v34, %v764_v55  ;;  %v790_v2 = vadd.f32 %v788_v28, %v765_v35 }
 0x213   :  { %v812_v42 = vmul.f32 %v810_v37, %v806_v36  ;;  %v813_v25 = vmul.f32 %v810_v37, %v807_v41 }
 0x215   :  { %v814_v7 = vadd.f32 %v812_v42, %v789_v40  ;;  %v815_v29 = vadd.f32 %v813_v25, %v790_v2 }
 0x217   :  { %v822_v23 = vadd.f32 %v820_v43, %v814_v7  ;;  %v823_v39 = vadd.f32 %v820_v43, %v815_v29 }
 0x219   :  { %v824_v12 = vsub.f32 0.0, %v822_v23  ;;  %v825_v47 = vsub.f32 0.0, %v823_v39 }
 0x21b   :  { %v826_v14 = vmul.f32 1.442695, %v824_v12  ;;  %v828_v48 = vmul.f32 1.442695, %v825_v47 }
 0x21d   :  { %980 = vpow2.f32 %v826_v14 }
 0x21e   :  { %982 = vpow2.f32 %v828_v48 }
 0x227   :  { %v981_v49 = vpop.eup %980 }
 0x228   :  { %v983_v13 = vpop.eup %982  ;;  %v830_v50 = vadd.f32 1.0, %v981_v49 }
 0x229   :  { %v831_v45 = vadd.f32 1.0, %v983_v13 }
 0x22a   :  { %984 = vrcp.f32 %v830_v50 }
 0x22b   :  { %986 = vrcp.f32 %v831_v45 }
 0x234   :  { %v985_v8 = vpop.eup %984 }
 0x235   :  { %v987_v51 = vpop.eup %986  ;;  %v836_v52 = vmul.f32 %v985_v8, %v822_v23 }
 0x236   :  { %v837_v54 = vmul.f32 %v987_v51, %v823_v39 }
 0x237   :  { %839 = vst [vmem:[#allocation2 + $0x10] sm:$0xff] %v836_v52 }
 0x238   :  { %840 = vst [vmem:[#allocation2 + $0x18] sm:$0xff] %v837_v54 }
 0x23e   :  { %v845_v31 = vld [vmem:[#allocation2 + $0x10] sm:$0xf]  ;;  %v865_v9 = vld [vmem:[#allocation2 + $0x10] sm:$0xf0] }
 0x23f   :  { %v846_v53 = vld [vmem:[#allocation2 + $0x18] sm:$0xf]  ;;  %v849_v46 = vrot.slane %v845_v31, 4  ;;  %v866_v56 = vld [vmem:[#allocation2 + $0x18] sm:$0xf0] }
 0x240   :  { %867 = vst [vmem:[#allocation8 + $0x10] sm:$0xf0] %v865_v9  ;;  %v850_v59 = vrot.slane %v846_v53, 4  ;;  %868 = vst [vmem:[#allocation8 + $0x18] sm:$0xf0] %v866_v56 }
 0x241   :  { %853 = vst [vmem:[#allocation8] sm:$0xf0] %v849_v46 }
 0x242   :  { %854 = vst [vmem:[#allocation8 + $0x8] sm:$0xf0] %v850_v59 }
 0x243   :  { %1043 = shalt.err (!%p1040_p6)
}
 0x244   :  { %s1044_s28 = scalar_lea.hbm %s1561_s6, 512 }
 0x245   :  { %p1045_p7 = scmp.ne.s32.totalorder %s1561_s6, %s1044_s28  ;;  %p1048_p8 = scmp.lt.u32.totalorder %s1044_s28, %s1561_s6 }
 0x247   :  { %p1050_p9 = pnand %p1048_p8, %p1045_p7 }
 0x249   :  { %1053 = shalt.err (!%p1050_p9)
}
 0x24a   :  { %880 = dma.vmem_to_hbm [thread:$0]  %s875_s25, 512, %s1561_s6, [#allocation5], %s1062_s1, %s1062_s1, %s1063_s19  }
 0x24b   :  { %1058 = dma.done.wait [#allocation5], 512  }
 0x24c   :  { %1059 = vsyncadd [#allocation5], 4294966784 }
 0x24d   :  { %884 = vsyncpa [#allocation4], 1 }
 0x24e   :  { %885 = vsyncpa [#allocation7], 1 }
 0x24f   :  { %886 = vsyncpa [#allocation5], 1 }

</bundles_post_ra>
